<compile_context>
chip_gen: v7x
topology: tpu7x:2x2x1
jax: 0.10.0
libtpu: 0.0.40
codegen_flags: <defaults>
</compile_context>

<pallas_src>
import numpy as np
import jax
import jax.numpy as jnp
from jax.experimental import pallas as pl
from jax.experimental.pallas import tpu as pltpu


# ----------------------------------------------------------------------------
# Pallas kernel: whole Net.forward for one image per grid step
# ----------------------------------------------------------------------------
def _lenet_kernel(x_ref, a1_ref, s1_ref, e1_ref, o1_ref, b1_ref,
                  a2_ref, s2_ref, e2_ref, o2_ref, b2_ref,
                  fc1w_ref, fc1b_ref, fc2w_ref, fc2b_ref, fc3w_ref, fc3b_ref,
                  out_ref):
    f32 = jnp.float32
    x = x_ref[0]                                        # (32, 96) = (H, W*3)

    # ---- conv1 (3->6, 5x5) as 5 banded matmuls over the kh taps -------------
    y1 = jnp.dot(x[0:28, :], a1_ref[0], preferred_element_type=f32)
    for dh in range(1, 5):
        y1 = y1 + jnp.dot(x[dh:dh + 28, :], a1_ref[dh],
                          preferred_element_type=f32)    # (28, 28*6)

    # ---- 2x2 max pool + bias + relu  (relu/bias commute with max) -----------
    yh = jnp.dot(s1_ref[...], y1, preferred_element_type=f32)   # rows: evens|odds
    ph = jnp.maximum(yh[0:14, :], yh[14:28, :])                  # (14, 168)
    pw = jnp.maximum(jnp.dot(ph, e1_ref[...], preferred_element_type=f32),
                     jnp.dot(ph, o1_ref[...], preferred_element_type=f32))
    h1 = jnp.maximum(pw + b1_ref[...], 0.0)                      # (14, 14*6)

    # ---- conv2 (6->16, 5x5) --------------------------------------------------
    y2 = jnp.dot(h1[0:10, :], a2_ref[0], preferred_element_type=f32)
    for dh in range(1, 5):
        y2 = y2 + jnp.dot(h1[dh:dh + 10, :], a2_ref[dh],
                          preferred_element_type=f32)    # (10, 10*16)

    yh2 = jnp.dot(s2_ref[...], y2, preferred_element_type=f32)
    ph2 = jnp.maximum(yh2[0:5, :], yh2[5:10, :])                 # (5, 160)
    pw2 = jnp.maximum(jnp.dot(ph2, e2_ref[...], preferred_element_type=f32),
                      jnp.dot(ph2, o2_ref[...], preferred_element_type=f32))
    h2 = jnp.maximum(pw2 + b2_ref[...], 0.0)                     # (5, 5*16)

    # ---- fc1: flatten (h, w, c) folded into 5 row-dots -----------------------
    acc = jnp.dot(h2[0:1, :], fc1w_ref[0:80, :], preferred_element_type=f32)
    for hh in range(1, 5):
        acc = acc + jnp.dot(h2[hh:hh + 1, :],
                            fc1w_ref[80 * hh:80 * hh + 80, :],
                            preferred_element_type=f32)          # (1, 128)
    h = jnp.maximum(acc + fc1b_ref[...], 0.0)

    # ---- fc2 / fc3 (128-padded, lane-dense) ----------------------------------
    h = jnp.maximum(jnp.dot(h, fc2w_ref[...], preferred_element_type=f32)
                    + fc2b_ref[...], 0.0)
    out = jnp.dot(h, fc3w_ref[...], preferred_element_type=f32) + fc3b_ref[...]
    out_ref[0] = out                                             # (1, 128)


# ----------------------------------------------------------------------------
# One-time weight repacking (wrapper-side, pure XLA / numpy constants)
# ----------------------------------------------------------------------------
def prepare_params(params):
    hp = jax.lax.Precision.HIGHEST

    # Placement tensors: M[dw, c, l, ow] = 1  iff  l == C*(ow+dw) + c
    M1 = np.zeros((5, 3, 96, 28), np.float32)
    for dw in range(5):
        for c in range(3):
            for ow in range(28):
                M1[dw, c, 3 * (ow + dw) + c, ow] = 1.0
    M2 = np.zeros((5, 6, 84, 10), np.float32)
    for dw in range(5):
        for c in range(6):
            for ow in range(10):
                M2[dw, c, 6 * (ow + dw) + c, ow] = 1.0

    # Banded conv weights: A[dh] maps an input row slab (W*Cin) -> (Wout*Cout)
    w1p = jnp.transpose(params["conv1_w"], (2, 3, 1, 0))          # (5,5,3,6)
    A1 = jnp.einsum('abcd,bcef->aefd', w1p, M1, precision=hp).reshape(5, 96, 28 * 6)
    w2p = jnp.transpose(params["conv2_w"], (2, 3, 1, 0))          # (5,5,6,16)
    A2 = jnp.einsum('abcd,bcef->aefd', w2p, M2, precision=hp).reshape(5, 84, 10 * 16)

    def row_sel(n):                      # (n, n): evens on top, odds below
        S = np.zeros((n, n), np.float32)
        h = n // 2
        for r in range(h):
            S[r, 2 * r] = 1.0
            S[h + r, 2 * r + 1] = 1.0
        return S

    def col_sel(w_out, c, parity):       # (2*w_out*c, w_out*c) column selector
        E = np.zeros((2 * w_out * c, w_out * c), np.float32)
        for j in range(w_out):
            for o in range(c):
                E[(2 * j + parity) * c + o, j * c + o] = 1.0
        return E

    S1, S2 = row_sel(28), row_sel(10)
    E1, O1 = col_sel(14, 6, 0), col_sel(14, 6, 1)
    E2, O2 = col_sel(5, 16, 0), col_sel(5, 16, 1)

    b1 = jnp.tile(params["conv1_b"], 14)[None, :]                 # (1, 84)
    b2 = jnp.tile(params["conv2_b"], 5)[None, :]                  # (1, 80)

    # fc1 reordered from torch's (c,h,w) flatten to our (h,w,c) layout, 128-pad
    fc1w = jnp.transpose(params["fc1_w"].reshape(120, 16, 5, 5), (2, 3, 1, 0))
    fc1w = jnp.pad(fc1w.reshape(400, 120), ((0, 0), (0, 8)))      # (400, 128)
    fc1b = jnp.pad(params["fc1_b"], (0, 8))[None, :]              # (1, 128)
    fc2w = jnp.pad(params["fc2_w"].T, ((0, 8), (0, 44)))          # (128, 128)
    fc2b = jnp.pad(params["fc2_b"], (0, 44))[None, :]
    fc3w = jnp.pad(params["fc3_w"].T, ((0, 44), (0, 118)))        # (128, 128)
    fc3b = jnp.pad(params["fc3_b"], (0, 118))[None, :]

    return dict(A1=A1, S1=jnp.asarray(S1), E1=jnp.asarray(E1), O1=jnp.asarray(O1),
                b1=b1, A2=A2, S2=jnp.asarray(S2), E2=jnp.asarray(E2),
                O2=jnp.asarray(O2), b2=b2, fc1w=fc1w, fc1b=fc1b,
                fc2w=fc2w, fc2b=fc2b, fc3w=fc3w, fc3b=fc3b)


# ----------------------------------------------------------------------------
# Net.forward: one fused pallas_call
# ----------------------------------------------------------------------------
def net_forward(x_nchw, prep):
    N = x_nchw.shape[0]
    xp = jnp.transpose(x_nchw, (0, 2, 3, 1)).reshape(N, 32, 96)   # (N, H, W*C)
    const2 = lambda i: (0, 0)
    const3 = lambda i: (0, 0, 0)

    out = pl.pallas_call(
        _lenet_kernel,
        out_shape=jax.ShapeDtypeStruct((N, 1, 128), jnp.float32),
        grid=(N,),
        in_specs=[
            pl.BlockSpec((1, 32, 96), lambda i: (i, 0, 0)),
            pl.BlockSpec((5, 96, 168), const3),
            pl.BlockSpec((28, 28), const2),
            pl.BlockSpec((168, 84), const2),
            pl.BlockSpec((168, 84), const2),
            pl.BlockSpec((1, 84), const2),
            pl.BlockSpec((5, 84, 160), const3),
            pl.BlockSpec((10, 10), const2),
            pl.BlockSpec((160, 80), const2),
            pl.BlockSpec((160, 80), const2),
            pl.BlockSpec((1, 80), const2),
            pl.BlockSpec((400, 128), const2),
            pl.BlockSpec((1, 128), const2),
            pl.BlockSpec((128, 128), const2),
            pl.BlockSpec((1, 128), const2),
            pl.BlockSpec((128, 128), const2),
            pl.BlockSpec((1, 128), const2),
        ],
        out_specs=pl.BlockSpec((1, 1, 128), lambda i: (i, 0, 0)),
        compiler_params=pltpu.CompilerParams(
            dimension_semantics=("parallel",),
            vmem_limit_bytes=32 * 1024 * 1024,
        ),
    )(xp, prep["A1"], prep["S1"], prep["E1"], prep["O1"], prep["b1"],
      prep["A2"], prep["S2"], prep["E2"], prep["O2"], prep["b2"],
      prep["fc1w"], prep["fc1b"], prep["fc2w"], prep["fc2b"],
      prep["fc3w"], prep["fc3b"])
    return out[:, 0, :10]


# ----------------------------------------------------------------------------
# Pure-JAX reference (for a self-check) and deterministic init
# ----------------------------------------------------------------------------
def net_forward_ref(x, params):
    def conv(x, w, b):
        y = jax.lax.conv_general_dilated(
            x, w, (1, 1), 'VALID', dimension_numbers=('NCHW', 'OIHW', 'NCHW'))
        return y + b[None, :, None, None]

    def pool(x):
        return jax.lax.reduce_window(x, -jnp.inf, jax.lax.max,
                                     (1, 1, 2, 2), (1, 1, 2, 2), 'VALID')

    with jax.default_matmul_precision('highest'):
        h = pool(jax.nn.relu(conv(x, params["conv1_w"], params["conv1_b"])))
        h = pool(jax.nn.relu(conv(h, params["conv2_w"], params["conv2_b"])))
        h = h.reshape(h.shape[0], -1)
        h = jax.nn.relu(h @ params["fc1_w"].T + params["fc1_b"])
        h = jax.nn.relu(h @ params["fc2_w"].T + params["fc2_b"])
        return h @ params["fc3_w"].T + params["fc3_b"]


def init_params(key):
    def uni(k, shape, fan_in):
        bound = 1.0 / jnp.sqrt(jnp.float32(fan_in))
        return jax.random.uniform(k, shape, jnp.float32, -bound, bound)

    ks = jax.random.split(key, 10)
    return {
        "conv1_w": uni(ks[0], (6, 3, 5, 5), 3 * 5 * 5),
        "conv1_b": uni(ks[1], (6,), 3 * 5 * 5),
        "conv2_w": uni(ks[2], (16, 6, 5, 5), 6 * 5 * 5),
        "conv2_b": uni(ks[3], (16,), 6 * 5 * 5),
        "fc1_w": uni(ks[4], (120, 400), 400),
        "fc1_b": uni(ks[5], (120,), 400),
        "fc2_w": uni(ks[6], (84, 120), 120),
        "fc2_b": uni(ks[7], (84,), 120),
        "fc3_w": uni(ks[8], (10, 84), 84),
        "fc3_b": uni(ks[9], (10,), 84),
    }


if __name__ == "__main__":
    key = jax.random.PRNGKey(0)
    k_param, k_x = jax.random.split(key)
    params = init_params(k_param)
    # Forward implies 3x32x32 input (LeNet-style: 32 -> 28 -> 14 -> 10 -> 5)
    x = jax.random.normal(k_x, (2, 3, 32, 32), jnp.float32)

    prep = prepare_params(params)                 # one-time weight repacking
    out = jax.jit(net_forward)(x, prep)
    out = jax.block_until_ready(out)

    assert out.shape == (2, 10), out.shape
    assert out.dtype == jnp.float32
    assert bool(jnp.all(jnp.isfinite(out)))

    ref = net_forward_ref(x, params)
    assert float(jnp.max(jnp.abs(out - ref))) < 5e-2, float(jnp.max(jnp.abs(out - ref)))

    print("KERNEL_OK")
</pallas_src>

<mosaic_0001>
module attributes {stable_mosaic.version = 11 : i64} {
  func.func @_lenet_kernel(%arg0: i32, %arg1: memref<1x32x96xf32, #tpu.memory_space<vmem>>, %arg2: memref<5x96x168xf32, #tpu.memory_space<vmem>>, %arg3: memref<28x28xf32, #tpu.memory_space<vmem>>, %arg4: memref<168x84xf32, #tpu.memory_space<vmem>>, %arg5: memref<168x84xf32, #tpu.memory_space<vmem>>, %arg6: memref<1x84xf32, #tpu.memory_space<vmem>>, %arg7: memref<5x84x160xf32, #tpu.memory_space<vmem>>, %arg8: memref<10x10xf32, #tpu.memory_space<vmem>>, %arg9: memref<160x80xf32, #tpu.memory_space<vmem>>, %arg10: memref<160x80xf32, #tpu.memory_space<vmem>>, %arg11: memref<1x80xf32, #tpu.memory_space<vmem>>, %arg12: memref<400x128xf32, #tpu.memory_space<vmem>>, %arg13: memref<1x128xf32, #tpu.memory_space<vmem>>, %arg14: memref<128x128xf32, #tpu.memory_space<vmem>>, %arg15: memref<1x128xf32, #tpu.memory_space<vmem>>, %arg16: memref<128x128xf32, #tpu.memory_space<vmem>>, %arg17: memref<1x128xf32, #tpu.memory_space<vmem>>, %arg18: memref<1x1x128xf32, #tpu.memory_space<vmem>>) attributes {dimension_semantics = [#tpu.dimension_semantics<parallel>], iteration_bounds = array<i64: 2>, scalar_prefetch = 0 : i64, scratch_operands = 0 : i64, tpu.core_type = #tpu.core_type<tc>, window_params = [{transform_indices = @transform_0, window_bounds = array<i64: 1, 32, 96>}, {pipeline_mode = #tpu.pipeline_mode<synchronous>, transform_indices = @transform_1, window_bounds = array<i64: 5, 96, 168>}, {pipeline_mode = #tpu.pipeline_mode<synchronous>, transform_indices = @transform_2, window_bounds = array<i64: 28, 28>}, {pipeline_mode = #tpu.pipeline_mode<synchronous>, transform_indices = @transform_3, window_bounds = array<i64: 168, 84>}, {pipeline_mode = #tpu.pipeline_mode<synchronous>, transform_indices = @transform_4, window_bounds = array<i64: 168, 84>}, {pipeline_mode = #tpu.pipeline_mode<synchronous>, transform_indices = @transform_5, window_bounds = array<i64: 1, 84>}, {pipeline_mode = #tpu.pipeline_mode<synchronous>, transform_indices = @transform_6, window_bounds = array<i64: 5, 84, 160>}, {pipeline_mode = #tpu.pipeline_mode<synchronous>, transform_indices = @transform_7, window_bounds = array<i64: 10, 10>}, {pipeline_mode = #tpu.pipeline_mode<synchronous>, transform_indices = @transform_8, window_bounds = array<i64: 160, 80>}, {pipeline_mode = #tpu.pipeline_mode<synchronous>, transform_indices = @transform_9, window_bounds = array<i64: 160, 80>}, {pipeline_mode = #tpu.pipeline_mode<synchronous>, transform_indices = @transform_10, window_bounds = array<i64: 1, 80>}, {pipeline_mode = #tpu.pipeline_mode<synchronous>, transform_indices = @transform_11, window_bounds = array<i64: 400, 128>}, {pipeline_mode = #tpu.pipeline_mode<synchronous>, transform_indices = @transform_12, window_bounds = array<i64: 1, 128>}, {pipeline_mode = #tpu.pipeline_mode<synchronous>, transform_indices = @transform_13, window_bounds = array<i64: 128, 128>}, {pipeline_mode = #tpu.pipeline_mode<synchronous>, transform_indices = @transform_14, window_bounds = array<i64: 1, 128>}, {pipeline_mode = #tpu.pipeline_mode<synchronous>, transform_indices = @transform_15, window_bounds = array<i64: 128, 128>}, {pipeline_mode = #tpu.pipeline_mode<synchronous>, transform_indices = @transform_16, window_bounds = array<i64: 1, 128>}, {transform_indices = @transform_17, window_bounds = array<i64: 1, 1, 128>}]} {
    %c0 = arith.constant 0 : index
    %c0_0 = arith.constant 0 : index
    %c0_1 = arith.constant 0 : index
    %0 = vector.load %arg1[%c0, %c0_0, %c0_1] : memref<1x32x96xf32, #tpu.memory_space<vmem>>, vector<1x32x96xf32>
    %1 = vector.shape_cast %0 : vector<1x32x96xf32> to vector<32x96xf32>
    %2 = vector.extract_strided_slice %1 {offsets = [0, 0], sizes = [28, 96], strides = [1, 1]} : vector<32x96xf32> to vector<28x96xf32>
    %c0_2 = arith.constant 0 : index
    %c0_3 = arith.constant 0 : index
    %c0_4 = arith.constant 0 : index
    %3 = vector.load %arg2[%c0_2, %c0_3, %c0_4] : memref<5x96x168xf32, #tpu.memory_space<vmem>>, vector<1x96x168xf32>
    %4 = vector.shape_cast %3 : vector<1x96x168xf32> to vector<96x168xf32>
    %cst = arith.constant dense<0.000000e+00> : vector<28x168xf32>
    %5 = tpu.matmul %2, %4, %cst {dimension_numbers = #tpu.dot_dimension_numbers<[1], [0], [0], [1], [0, 0, 1, 1], [], []>} : vector<28x96xf32>, vector<96x168xf32>, vector<28x168xf32> -> vector<28x168xf32>
    %6 = vector.extract_strided_slice %1 {offsets = [1, 0], sizes = [28, 96], strides = [1, 1]} : vector<32x96xf32> to vector<28x96xf32>
    %c1 = arith.constant 1 : index
    %c0_5 = arith.constant 0 : index
    %c0_6 = arith.constant 0 : index
    %7 = vector.load %arg2[%c1, %c0_5, %c0_6] : memref<5x96x168xf32, #tpu.memory_space<vmem>>, vector<1x96x168xf32>
    %8 = vector.shape_cast %7 : vector<1x96x168xf32> to vector<96x168xf32>
    %cst_7 = arith.constant dense<0.000000e+00> : vector<28x168xf32>
    %9 = tpu.matmul %6, %8, %cst_7 {dimension_numbers = #tpu.dot_dimension_numbers<[1], [0], [0], [1], [0, 0, 1, 1], [], []>} : vector<28x96xf32>, vector<96x168xf32>, vector<28x168xf32> -> vector<28x168xf32>
    %10 = arith.addf %5, %9 : vector<28x168xf32>
    %11 = vector.extract_strided_slice %1 {offsets = [2, 0], sizes = [28, 96], strides = [1, 1]} : vector<32x96xf32> to vector<28x96xf32>
    %c2 = arith.constant 2 : index
    %c0_8 = arith.constant 0 : index
    %c0_9 = arith.constant 0 : index
    %12 = vector.load %arg2[%c2, %c0_8, %c0_9] : memref<5x96x168xf32, #tpu.memory_space<vmem>>, vector<1x96x168xf32>
    %13 = vector.shape_cast %12 : vector<1x96x168xf32> to vector<96x168xf32>
    %cst_10 = arith.constant dense<0.000000e+00> : vector<28x168xf32>
    %14 = tpu.matmul %11, %13, %cst_10 {dimension_numbers = #tpu.dot_dimension_numbers<[1], [0], [0], [1], [0, 0, 1, 1], [], []>} : vector<28x96xf32>, vector<96x168xf32>, vector<28x168xf32> -> vector<28x168xf32>
    %15 = arith.addf %10, %14 : vector<28x168xf32>
    %16 = vector.extract_strided_slice %1 {offsets = [3, 0], sizes = [28, 96], strides = [1, 1]} : vector<32x96xf32> to vector<28x96xf32>
    %c3 = arith.constant 3 : index
    %c0_11 = arith.constant 0 : index
    %c0_12 = arith.constant 0 : index
    %17 = vector.load %arg2[%c3, %c0_11, %c0_12] : memref<5x96x168xf32, #tpu.memory_space<vmem>>, vector<1x96x168xf32>
    %18 = vector.shape_cast %17 : vector<1x96x168xf32> to vector<96x168xf32>
    %cst_13 = arith.constant dense<0.000000e+00> : vector<28x168xf32>
    %19 = tpu.matmul %16, %18, %cst_13 {dimension_numbers = #tpu.dot_dimension_numbers<[1], [0], [0], [1], [0, 0, 1, 1], [], []>} : vector<28x96xf32>, vector<96x168xf32>, vector<28x168xf32> -> vector<28x168xf32>
    %20 = arith.addf %15, %19 : vector<28x168xf32>
    %21 = vector.extract_strided_slice %1 {offsets = [4, 0], sizes = [28, 96], strides = [1, 1]} : vector<32x96xf32> to vector<28x96xf32>
    %c4 = arith.constant 4 : index
    %c0_14 = arith.constant 0 : index
    %c0_15 = arith.constant 0 : index
    %22 = vector.load %arg2[%c4, %c0_14, %c0_15] : memref<5x96x168xf32, #tpu.memory_space<vmem>>, vector<1x96x168xf32>
    %23 = vector.shape_cast %22 : vector<1x96x168xf32> to vector<96x168xf32>
    %cst_16 = arith.constant dense<0.000000e+00> : vector<28x168xf32>
    %24 = tpu.matmul %21, %23, %cst_16 {dimension_numbers = #tpu.dot_dimension_numbers<[1], [0], [0], [1], [0, 0, 1, 1], [], []>} : vector<28x96xf32>, vector<96x168xf32>, vector<28x168xf32> -> vector<28x168xf32>
    %25 = arith.addf %20, %24 : vector<28x168xf32>
    %c0_17 = arith.constant 0 : index
    %c0_18 = arith.constant 0 : index
    %26 = vector.load %arg3[%c0_17, %c0_18] : memref<28x28xf32, #tpu.memory_space<vmem>>, vector<28x28xf32>
    %cst_19 = arith.constant dense<0.000000e+00> : vector<28x168xf32>
    %27 = tpu.matmul %26, %25, %cst_19 {dimension_numbers = #tpu.dot_dimension_numbers<[1], [0], [0], [1], [0, 0, 1, 1], [], []>} : vector<28x28xf32>, vector<28x168xf32>, vector<28x168xf32> -> vector<28x168xf32>
    %28 = vector.extract_strided_slice %27 {offsets = [0, 0], sizes = [14, 168], strides = [1, 1]} : vector<28x168xf32> to vector<14x168xf32>
    %29 = vector.extract_strided_slice %27 {offsets = [14, 0], sizes = [14, 168], strides = [1, 1]} : vector<28x168xf32> to vector<14x168xf32>
    %30 = arith.maximumf %28, %29 : vector<14x168xf32>
    %c0_20 = arith.constant 0 : index
    %c0_21 = arith.constant 0 : index
    %31 = vector.load %arg4[%c0_20, %c0_21] : memref<168x84xf32, #tpu.memory_space<vmem>>, vector<168x84xf32>
    %cst_22 = arith.constant dense<0.000000e+00> : vector<14x84xf32>
    %32 = tpu.matmul %30, %31, %cst_22 {dimension_numbers = #tpu.dot_dimension_numbers<[1], [0], [0], [1], [0, 0, 1, 1], [], []>} : vector<14x168xf32>, vector<168x84xf32>, vector<14x84xf32> -> vector<14x84xf32>
    %c0_23 = arith.constant 0 : index
    %c0_24 = arith.constant 0 : index
    %33 = vector.load %arg5[%c0_23, %c0_24] : memref<168x84xf32, #tpu.memory_space<vmem>>, vector<168x84xf32>
    %cst_25 = arith.constant dense<0.000000e+00> : vector<14x84xf32>
    %34 = tpu.matmul %30, %33, %cst_25 {dimension_numbers = #tpu.dot_dimension_numbers<[1], [0], [0], [1], [0, 0, 1, 1], [], []>} : vector<14x168xf32>, vector<168x84xf32>, vector<14x84xf32> -> vector<14x84xf32>
    %35 = arith.maximumf %32, %34 : vector<14x84xf32>
    %c0_26 = arith.constant 0 : index
    %c0_27 = arith.constant 0 : index
    %36 = vector.load %arg6[%c0_26, %c0_27] : memref<1x84xf32, #tpu.memory_space<vmem>>, vector<1x84xf32>
    %37 = vector.broadcast %36 : vector<1x84xf32> to vector<14x84xf32>
    %38 = arith.addf %35, %37 : vector<14x84xf32>
    %cst_28 = arith.constant 0.000000e+00 : f32
    %39 = vector.broadcast %cst_28 : f32 to vector<14x84xf32>
    %40 = arith.maximumf %38, %39 : vector<14x84xf32>
    %41 = vector.extract_strided_slice %40 {offsets = [0, 0], sizes = [10, 84], strides = [1, 1]} : vector<14x84xf32> to vector<10x84xf32>
    %c0_29 = arith.constant 0 : index
    %c0_30 = arith.constant 0 : index
    %c0_31 = arith.constant 0 : index
    %42 = vector.load %arg7[%c0_29, %c0_30, %c0_31] : memref<5x84x160xf32, #tpu.memory_space<vmem>>, vector<1x84x160xf32>
    %43 = vector.shape_cast %42 : vector<1x84x160xf32> to vector<84x160xf32>
    %cst_32 = arith.constant dense<0.000000e+00> : vector<10x160xf32>
    %44 = tpu.matmul %41, %43, %cst_32 {dimension_numbers = #tpu.dot_dimension_numbers<[1], [0], [0], [1], [0, 0, 1, 1], [], []>} : vector<10x84xf32>, vector<84x160xf32>, vector<10x160xf32> -> vector<10x160xf32>
    %45 = vector.extract_strided_slice %40 {offsets = [1, 0], sizes = [10, 84], strides = [1, 1]} : vector<14x84xf32> to vector<10x84xf32>
    %c1_33 = arith.constant 1 : index
    %c0_34 = arith.constant 0 : index
    %c0_35 = arith.constant 0 : index
    %46 = vector.load %arg7[%c1_33, %c0_34, %c0_35] : memref<5x84x160xf32, #tpu.memory_space<vmem>>, vector<1x84x160xf32>
    %47 = vector.shape_cast %46 : vector<1x84x160xf32> to vector<84x160xf32>
    %cst_36 = arith.constant dense<0.000000e+00> : vector<10x160xf32>
    %48 = tpu.matmul %45, %47, %cst_36 {dimension_numbers = #tpu.dot_dimension_numbers<[1], [0], [0], [1], [0, 0, 1, 1], [], []>} : vector<10x84xf32>, vector<84x160xf32>, vector<10x160xf32> -> vector<10x160xf32>
    %49 = arith.addf %44, %48 : vector<10x160xf32>
    %50 = vector.extract_strided_slice %40 {offsets = [2, 0], sizes = [10, 84], strides = [1, 1]} : vector<14x84xf32> to vector<10x84xf32>
    %c2_37 = arith.constant 2 : index
    %c0_38 = arith.constant 0 : index
    %c0_39 = arith.constant 0 : index
    %51 = vector.load %arg7[%c2_37, %c0_38, %c0_39] : memref<5x84x160xf32, #tpu.memory_space<vmem>>, vector<1x84x160xf32>
    %52 = vector.shape_cast %51 : vector<1x84x160xf32> to vector<84x160xf32>
    %cst_40 = arith.constant dense<0.000000e+00> : vector<10x160xf32>
    %53 = tpu.matmul %50, %52, %cst_40 {dimension_numbers = #tpu.dot_dimension_numbers<[1], [0], [0], [1], [0, 0, 1, 1], [], []>} : vector<10x84xf32>, vector<84x160xf32>, vector<10x160xf32> -> vector<10x160xf32>
    %54 = arith.addf %49, %53 : vector<10x160xf32>
    %55 = vector.extract_strided_slice %40 {offsets = [3, 0], sizes = [10, 84], strides = [1, 1]} : vector<14x84xf32> to vector<10x84xf32>
    %c3_41 = arith.constant 3 : index
    %c0_42 = arith.constant 0 : index
    %c0_43 = arith.constant 0 : index
    %56 = vector.load %arg7[%c3_41, %c0_42, %c0_43] : memref<5x84x160xf32, #tpu.memory_space<vmem>>, vector<1x84x160xf32>
    %57 = vector.shape_cast %56 : vector<1x84x160xf32> to vector<84x160xf32>
    %cst_44 = arith.constant dense<0.000000e+00> : vector<10x160xf32>
    %58 = tpu.matmul %55, %57, %cst_44 {dimension_numbers = #tpu.dot_dimension_numbers<[1], [0], [0], [1], [0, 0, 1, 1], [], []>} : vector<10x84xf32>, vector<84x160xf32>, vector<10x160xf32> -> vector<10x160xf32>
    %59 = arith.addf %54, %58 : vector<10x160xf32>
    %60 = vector.extract_strided_slice %40 {offsets = [4, 0], sizes = [10, 84], strides = [1, 1]} : vector<14x84xf32> to vector<10x84xf32>
    %c4_45 = arith.constant 4 : index
    %c0_46 = arith.constant 0 : index
    %c0_47 = arith.constant 0 : index
    %61 = vector.load %arg7[%c4_45, %c0_46, %c0_47] : memref<5x84x160xf32, #tpu.memory_space<vmem>>, vector<1x84x160xf32>
    %62 = vector.shape_cast %61 : vector<1x84x160xf32> to vector<84x160xf32>
    %cst_48 = arith.constant dense<0.000000e+00> : vector<10x160xf32>
    %63 = tpu.matmul %60, %62, %cst_48 {dimension_numbers = #tpu.dot_dimension_numbers<[1], [0], [0], [1], [0, 0, 1, 1], [], []>} : vector<10x84xf32>, vector<84x160xf32>, vector<10x160xf32> -> vector<10x160xf32>
    %64 = arith.addf %59, %63 : vector<10x160xf32>
    %c0_49 = arith.constant 0 : index
    %c0_50 = arith.constant 0 : index
    %65 = vector.load %arg8[%c0_49, %c0_50] : memref<10x10xf32, #tpu.memory_space<vmem>>, vector<10x10xf32>
    %cst_51 = arith.constant dense<0.000000e+00> : vector<10x160xf32>
    %66 = tpu.matmul %65, %64, %cst_51 {dimension_numbers = #tpu.dot_dimension_numbers<[1], [0], [0], [1], [0, 0, 1, 1], [], []>} : vector<10x10xf32>, vector<10x160xf32>, vector<10x160xf32> -> vector<10x160xf32>
    %67 = vector.extract_strided_slice %66 {offsets = [0, 0], sizes = [5, 160], strides = [1, 1]} : vector<10x160xf32> to vector<5x160xf32>
    %68 = vector.extract_strided_slice %66 {offsets = [5, 0], sizes = [5, 160], strides = [1, 1]} : vector<10x160xf32> to vector<5x160xf32>
    %69 = arith.maximumf %67, %68 : vector<5x160xf32>
    %c0_52 = arith.constant 0 : index
    %c0_53 = arith.constant 0 : index
    %70 = vector.load %arg9[%c0_52, %c0_53] : memref<160x80xf32, #tpu.memory_space<vmem>>, vector<160x80xf32>
    %cst_54 = arith.constant dense<0.000000e+00> : vector<5x80xf32>
    %71 = tpu.matmul %69, %70, %cst_54 {dimension_numbers = #tpu.dot_dimension_numbers<[1], [0], [0], [1], [0, 0, 1, 1], [], []>} : vector<5x160xf32>, vector<160x80xf32>, vector<5x80xf32> -> vector<5x80xf32>
    %c0_55 = arith.constant 0 : index
    %c0_56 = arith.constant 0 : index
    %72 = vector.load %arg10[%c0_55, %c0_56] : memref<160x80xf32, #tpu.memory_space<vmem>>, vector<160x80xf32>
    %cst_57 = arith.constant dense<0.000000e+00> : vector<5x80xf32>
    %73 = tpu.matmul %69, %72, %cst_57 {dimension_numbers = #tpu.dot_dimension_numbers<[1], [0], [0], [1], [0, 0, 1, 1], [], []>} : vector<5x160xf32>, vector<160x80xf32>, vector<5x80xf32> -> vector<5x80xf32>
    %74 = arith.maximumf %71, %73 : vector<5x80xf32>
    %c0_58 = arith.constant 0 : index
    %c0_59 = arith.constant 0 : index
    %75 = vector.load %arg11[%c0_58, %c0_59] : memref<1x80xf32, #tpu.memory_space<vmem>>, vector<1x80xf32>
    %76 = vector.broadcast %75 : vector<1x80xf32> to vector<5x80xf32>
    %77 = arith.addf %74, %76 : vector<5x80xf32>
    %cst_60 = arith.constant 0.000000e+00 : f32
    %78 = vector.broadcast %cst_60 : f32 to vector<5x80xf32>
    %79 = arith.maximumf %77, %78 : vector<5x80xf32>
    %80 = vector.extract_strided_slice %79 {offsets = [0, 0], sizes = [1, 80], strides = [1, 1]} : vector<5x80xf32> to vector<1x80xf32>
    %c0_61 = arith.constant 0 : index
    %c0_62 = arith.constant 0 : index
    %81 = vector.load %arg12[%c0_61, %c0_62] : memref<400x128xf32, #tpu.memory_space<vmem>>, vector<80x128xf32>
    %cst_63 = arith.constant dense<0.000000e+00> : vector<1x128xf32>
    %82 = tpu.matmul %80, %81, %cst_63 {dimension_numbers = #tpu.dot_dimension_numbers<[1], [0], [0], [1], [0, 0, 1, 1], [], []>} : vector<1x80xf32>, vector<80x128xf32>, vector<1x128xf32> -> vector<1x128xf32>
    %83 = vector.extract_strided_slice %79 {offsets = [1, 0], sizes = [1, 80], strides = [1, 1]} : vector<5x80xf32> to vector<1x80xf32>
    %c80 = arith.constant 80 : index
    %c0_64 = arith.constant 0 : index
    %84 = vector.load %arg12[%c80, %c0_64] : memref<400x128xf32, #tpu.memory_space<vmem>>, vector<80x128xf32>
    %cst_65 = arith.constant dense<0.000000e+00> : vector<1x128xf32>
    %85 = tpu.matmul %83, %84, %cst_65 {dimension_numbers = #tpu.dot_dimension_numbers<[1], [0], [0], [1], [0, 0, 1, 1], [], []>} : vector<1x80xf32>, vector<80x128xf32>, vector<1x128xf32> -> vector<1x128xf32>
    %86 = arith.addf %82, %85 : vector<1x128xf32>
    %87 = vector.extract_strided_slice %79 {offsets = [2, 0], sizes = [1, 80], strides = [1, 1]} : vector<5x80xf32> to vector<1x80xf32>
    %c160 = arith.constant 160 : index
    %c0_66 = arith.constant 0 : index
    %88 = vector.load %arg12[%c160, %c0_66] : memref<400x128xf32, #tpu.memory_space<vmem>>, vector<80x128xf32>
    %cst_67 = arith.constant dense<0.000000e+00> : vector<1x128xf32>
    %89 = tpu.matmul %87, %88, %cst_67 {dimension_numbers = #tpu.dot_dimension_numbers<[1], [0], [0], [1], [0, 0, 1, 1], [], []>} : vector<1x80xf32>, vector<80x128xf32>, vector<1x128xf32> -> vector<1x128xf32>
    %90 = arith.addf %86, %89 : vector<1x128xf32>
    %91 = vector.extract_strided_slice %79 {offsets = [3, 0], sizes = [1, 80], strides = [1, 1]} : vector<5x80xf32> to vector<1x80xf32>
    %c240 = arith.constant 240 : index
    %c0_68 = arith.constant 0 : index
    %92 = vector.load %arg12[%c240, %c0_68] : memref<400x128xf32, #tpu.memory_space<vmem>>, vector<80x128xf32>
    %cst_69 = arith.constant dense<0.000000e+00> : vector<1x128xf32>
    %93 = tpu.matmul %91, %92, %cst_69 {dimension_numbers = #tpu.dot_dimension_numbers<[1], [0], [0], [1], [0, 0, 1, 1], [], []>} : vector<1x80xf32>, vector<80x128xf32>, vector<1x128xf32> -> vector<1x128xf32>
    %94 = arith.addf %90, %93 : vector<1x128xf32>
    %95 = vector.extract_strided_slice %79 {offsets = [4, 0], sizes = [1, 80], strides = [1, 1]} : vector<5x80xf32> to vector<1x80xf32>
    %c320 = arith.constant 320 : index
    %c0_70 = arith.constant 0 : index
    %96 = vector.load %arg12[%c320, %c0_70] : memref<400x128xf32, #tpu.memory_space<vmem>>, vector<80x128xf32>
    %cst_71 = arith.constant dense<0.000000e+00> : vector<1x128xf32>
    %97 = tpu.matmul %95, %96, %cst_71 {dimension_numbers = #tpu.dot_dimension_numbers<[1], [0], [0], [1], [0, 0, 1, 1], [], []>} : vector<1x80xf32>, vector<80x128xf32>, vector<1x128xf32> -> vector<1x128xf32>
    %98 = arith.addf %94, %97 : vector<1x128xf32>
    %c0_72 = arith.constant 0 : index
    %c0_73 = arith.constant 0 : index
    %99 = vector.load %arg13[%c0_72, %c0_73] : memref<1x128xf32, #tpu.memory_space<vmem>>, vector<1x128xf32>
    %100 = arith.addf %98, %99 : vector<1x128xf32>
    %cst_74 = arith.constant 0.000000e+00 : f32
    %101 = vector.broadcast %cst_74 : f32 to vector<1x128xf32>
    %102 = arith.maximumf %100, %101 : vector<1x128xf32>
    %c0_75 = arith.constant 0 : index
    %c0_76 = arith.constant 0 : index
    %103 = vector.load %arg14[%c0_75, %c0_76] : memref<128x128xf32, #tpu.memory_space<vmem>>, vector<128x128xf32>
    %cst_77 = arith.constant dense<0.000000e+00> : vector<1x128xf32>
    %104 = tpu.matmul %102, %103, %cst_77 {dimension_numbers = #tpu.dot_dimension_numbers<[1], [0], [0], [1], [0, 0, 1, 1], [], []>} : vector<1x128xf32>, vector<128x128xf32>, vector<1x128xf32> -> vector<1x128xf32>
    %c0_78 = arith.constant 0 : index
    %c0_79 = arith.constant 0 : index
    %105 = vector.load %arg15[%c0_78, %c0_79] : memref<1x128xf32, #tpu.memory_space<vmem>>, vector<1x128xf32>
    %106 = arith.addf %104, %105 : vector<1x128xf32>
    %cst_80 = arith.constant 0.000000e+00 : f32
    %107 = vector.broadcast %cst_80 : f32 to vector<1x128xf32>
    %108 = arith.maximumf %106, %107 : vector<1x128xf32>
    %c0_81 = arith.constant 0 : index
    %c0_82 = arith.constant 0 : index
    %109 = vector.load %arg16[%c0_81, %c0_82] : memref<128x128xf32, #tpu.memory_space<vmem>>, vector<128x128xf32>
    %cst_83 = arith.constant dense<0.000000e+00> : vector<1x128xf32>
    %110 = tpu.matmul %108, %109, %cst_83 {dimension_numbers = #tpu.dot_dimension_numbers<[1], [0], [0], [1], [0, 0, 1, 1], [], []>} : vector<1x128xf32>, vector<128x128xf32>, vector<1x128xf32> -> vector<1x128xf32>
    %c0_84 = arith.constant 0 : index
    %c0_85 = arith.constant 0 : index
    %111 = vector.load %arg17[%c0_84, %c0_85] : memref<1x128xf32, #tpu.memory_space<vmem>>, vector<1x128xf32>
    %112 = arith.addf %110, %111 : vector<1x128xf32>
    %c0_86 = arith.constant 0 : index
    %c0_87 = arith.constant 0 : index
    %c0_88 = arith.constant 0 : index
    %113 = vector.load %arg18[%c0_86, %c0_87, %c0_88] : memref<1x1x128xf32, #tpu.memory_space<vmem>>, vector<1x1x128xf32>
    %114 = vector.shape_cast %113 : vector<1x1x128xf32> to vector<1x128xf32>
    %115 = vector.shape_cast %112 : vector<1x128xf32> to vector<1x1x128xf32>
    tpu.vector_store %arg18[%c0_86, %c0_87, %c0_88], %115 {strides = array<i32>} : memref<1x1x128xf32, #tpu.memory_space<vmem>>, vector<1x1x128xf32>,
    return
  }
  func.func @transform_0(%arg0: i32) -> (i32, i32, i32) {
    %c0_i32 = arith.constant 0 : i32
    %c0_i32_0 = arith.constant 0 : i32
    %c0_i32_1 = arith.constant 0 : i32
    return %arg0, %c0_i32, %c0_i32_0 : i32, i32, i32
  }
  func.func @transform_1(%arg0: i32) -> (i32, i32, i32) {
    %c0_i32 = arith.constant 0 : i32
    %c0_i32_0 = arith.constant 0 : i32
    %c0_i32_1 = arith.constant 0 : i32
    %c0_i32_2 = arith.constant 0 : i32
    return %c0_i32, %c0_i32_0, %c0_i32_1 : i32, i32, i32
  }
  func.func @transform_2(%arg0: i32) -> (i32, i32) {
    %c0_i32 = arith.constant 0 : i32
    %c0_i32_0 = arith.constant 0 : i32
    %c0_i32_1 = arith.constant 0 : i32
    return %c0_i32, %c0_i32_0 : i32, i32
  }
  func.func @transform_3(%arg0: i32) -> (i32, i32) {
    %c0_i32 = arith.constant 0 : i32
    %c0_i32_0 = arith.constant 0 : i32
    %c0_i32_1 = arith.constant 0 : i32
    return %c0_i32, %c0_i32_0 : i32, i32
  }
  func.func @transform_4(%arg0: i32) -> (i32, i32) {
    %c0_i32 = arith.constant 0 : i32
    %c0_i32_0 = arith.constant 0 : i32
    %c0_i32_1 = arith.constant 0 : i32
    return %c0_i32, %c0_i32_0 : i32, i32
  }
  func.func @transform_5(%arg0: i32) -> (i32, i32) {
    %c0_i32 = arith.constant 0 : i32
    %c0_i32_0 = arith.constant 0 : i32
    %c0_i32_1 = arith.constant 0 : i32
    return %c0_i32, %c0_i32_0 : i32, i32
  }
  func.func @transform_6(%arg0: i32) -> (i32, i32, i32) {
    %c0_i32 = arith.constant 0 : i32
    %c0_i32_0 = arith.constant 0 : i32
    %c0_i32_1 = arith.constant 0 : i32
    %c0_i32_2 = arith.constant 0 : i32
    return %c0_i32, %c0_i32_0, %c0_i32_1 : i32, i32, i32
  }
  func.func @transform_7(%arg0: i32) -> (i32, i32) {
    %c0_i32 = arith.constant 0 : i32
    %c0_i32_0 = arith.constant 0 : i32
    %c0_i32_1 = arith.constant 0 : i32
    return %c0_i32, %c0_i32_0 : i32, i32
  }
  func.func @transform_8(%arg0: i32) -> (i32, i32) {
    %c0_i32 = arith.constant 0 : i32
    %c0_i32_0 = arith.constant 0 : i32
    %c0_i32_1 = arith.constant 0 : i32
    return %c0_i32, %c0_i32_0 : i32, i32
  }
  func.func @transform_9(%arg0: i32) -> (i32, i32) {
    %c0_i32 = arith.constant 0 : i32
    %c0_i32_0 = arith.constant 0 : i32
    %c0_i32_1 = arith.constant 0 : i32
    return %c0_i32, %c0_i32_0 : i32, i32
  }
  func.func @transform_10(%arg0: i32) -> (i32, i32) {
    %c0_i32 = arith.constant 0 : i32
    %c0_i32_0 = arith.constant 0 : i32
    %c0_i32_1 = arith.constant 0 : i32
    return %c0_i32, %c0_i32_0 : i32, i32
  }
  func.func @transform_11(%arg0: i32) -> (i32, i32) {
    %c0_i32 = arith.constant 0 : i32
    %c0_i32_0 = arith.constant 0 : i32
    %c0_i32_1 = arith.constant 0 : i32
    return %c0_i32, %c0_i32_0 : i32, i32
  }
  func.func @transform_12(%arg0: i32) -> (i32, i32) {
    %c0_i32 = arith.constant 0 : i32
    %c0_i32_0 = arith.constant 0 : i32
    %c0_i32_1 = arith.constant 0 : i32
    return %c0_i32, %c0_i32_0 : i32, i32
  }
  func.func @transform_13(%arg0: i32) -> (i32, i32) {
    %c0_i32 = arith.constant 0 : i32
    %c0_i32_0 = arith.constant 0 : i32
    %c0_i32_1 = arith.constant 0 : i32
    return %c0_i32, %c0_i32_0 : i32, i32
  }
  func.func @transform_14(%arg0: i32) -> (i32, i32) {
    %c0_i32 = arith.constant 0 : i32
    %c0_i32_0 = arith.constant 0 : i32
    %c0_i32_1 = arith.constant 0 : i32
    return %c0_i32, %c0_i32_0 : i32, i32
  }
  func.func @transform_15(%arg0: i32) -> (i32, i32) {
    %c0_i32 = arith.constant 0 : i32
    %c0_i32_0 = arith.constant 0 : i32
    %c0_i32_1 = arith.constant 0 : i32
    return %c0_i32, %c0_i32_0 : i32, i32
  }
  func.func @transform_16(%arg0: i32) -> (i32, i32) {
    %c0_i32 = arith.constant 0 : i32
    %c0_i32_0 = arith.constant 0 : i32
    %c0_i32_1 = arith.constant 0 : i32
    return %c0_i32, %c0_i32_0 : i32, i32
  }
  func.func @transform_17(%arg0: i32) -> (i32, i32, i32) {
    %c0_i32 = arith.constant 0 : i32
    %c0_i32_0 = arith.constant 0 : i32
    %c0_i32_1 = arith.constant 0 : i32
    return %arg0, %c0_i32, %c0_i32_0 : i32, i32, i32
  }
}

</mosaic_0001>

<bundles_post_ra>
// kernel: net_forward.1
= control target key start
LH: loop header
LB: loop body
LE: loop exit
PB: predicated region body
PF: predicated region fallthrough
CT: control target
= control target key end

     0   :  { %s6003_s0 = inlined_call_operand.vmem [shape: f32[2,32,96], index: 0, kind: input, shape index: {}]   ;;  %s6004_s1 = inlined_call_operand.vmem [shape: f32[5,96,168], index: 1, kind: input, shape index: {}]   ;;  %s6005_s2 = inlined_call_operand.vmem [shape: f32[28,28], index: 2, kind: input, shape index: {}]   ;;  %s6006_s3 = inlined_call_operand.vmem [shape: f32[168,84], index: 3, kind: input, shape index: {}]   ;;  %s6007_s4 = inlined_call_operand.vmem [shape: f32[168,84], index: 4, kind: input, shape index: {}]   ;;  %s6008_s5 = inlined_call_operand.vmem [shape: f32[1,84], index: 5, kind: input, shape index: {}]   ;;  %s6009_s6 = inlined_call_operand.vmem [shape: f32[5,84,160], index: 6, kind: input, shape index: {}]   ;;  %s6010_s7 = inlined_call_operand.vmem [shape: f32[10,10], index: 7, kind: input, shape index: {}]   ;;  %s6011_s8 = inlined_call_operand.vmem [shape: f32[160,80], index: 8, kind: input, shape index: {}]   ;;  %s6012_s9 = inlined_call_operand.vmem [shape: f32[160,80], index: 9, kind: input, shape index: {}]   ;;  %s6013_s10 = inlined_call_operand.vmem [shape: f32[1,80], index: 10, kind: input, shape index: {}]   ;;  %s6014_s11 = inlined_call_operand.vmem [shape: f32[400,128], index: 11, kind: input, shape index: {}]   ;;  %s6015_s12 = inlined_call_operand.vmem [shape: f32[1,128], index: 12, kind: input, shape index: {}]   ;;  %s6016_s13 = inlined_call_operand.vmem [shape: f32[128,128], index: 13, kind: input, shape index: {}]   ;;  %s6017_s14 = inlined_call_operand.vmem [shape: f32[1,128], index: 14, kind: input, shape index: {}]   ;;  %s6018_s15 = inlined_call_operand.vmem [shape: f32[128,128], index: 15, kind: input, shape index: {}]   ;;  %s6019_s16 = inlined_call_operand.vmem [shape: f32[1,128], index: 16, kind: input, shape index: {}]   ;;  %s6020_s17 = inlined_call_operand.hbm [shape: f32[2,1,128], index: 17, kind: output, shape index: {}]  }
   0x1   :  { %6029 = sst [smem:[#allocation11_spill]] %s6003_s0 }
   0x2   :  { %6030 = sst [smem:[#allocation12_spill]] %s6004_s1 }
   0x3   :  { %6031 = sst [smem:[#allocation13_spill]] %s6019_s16 }
   0x4   :  { %6032 = sst [smem:[#allocation14_spill]] %s6020_s17 }
   0x5   :  { %22 = vsyncpa [#allocation3], 0 }
   0x6   :  { %24 = vsyncpa [#allocation3 + $0x1], 0  ;;  %s4372_s24 = smov 0   ;;  %s4374_s25 = smov 0  }
   0x7   :  { %s4376_s26 = smov 0   ;;  %s4378_s27 = smov 0  }
   0x8 LB: > { %6033 = sst [smem:[#allocation5_spill]] %s4263_s24  ;;  %s4393_s28 = sadd.s32 4294967295, %s4275_s27   ;;  %s4275_s27 = sphi %s4378_s27, %s6048_s27   ;;  %s4271_s26 = sphi %s4376_s26, %s6050_s26   ;;  %s4267_s25 = sphi %s4374_s25, %s6052_s25   ;;  %s4263_s24 = sphi %s4372_s24, %s6051_s24  }
   0x9   : > { %6034 = sst [smem:[#allocation6_spill]] %s4271_s26  ;;  %s3112_s29 = sadd.s32 4294967294, %s4275_s27  }
   0xa   : > { %6035 = sst [smem:[#allocation7_spill]] %s4275_s27  ;;  %s4397_s0 = sadd.s32 1, %s4275_s27  }
   0xb   : > { %6036 = sst [smem:[#allocation8_spill]] %s4397_s0  ;;  %s399_s30 = sadd.s32 1, %s4271_s26 }
   0xc   : > { %s396_s18 = ssub.s32 %s4275_s27, %s4397_s0  ;;  %p409_p0 = scmp.ne.s32.totalorder %s4271_s26, %s4267_s25 }
   0xd   : > { %p397_p1 = scmp.eq.s32.totalorder %s396_s18, 0  ;;  %p410_p2 = scmp.eq.s32.totalorder %s4393_s28, 1 }
   0xe   : > { %p415_p3 = scmp.ne.s32.totalorder %s4267_s25, %s4263_s24  ;;  %p416_p4 = scmp.eq.s32.totalorder %s3112_s29, 1 }
   0xf   : > { %s4408_s19 = scalar_select %p397_p1, %s4271_s26, %s399_s30  }
  0x10   : > { %p4410_p5 = por %p410_p2, %p409_p0  ;;  %p4414_p6 = por %p416_p4, %p415_p3 }
  0x11   : > { %6037 = sst [smem:[#allocation9_spill]] %s4408_s19  ;;  %p3115_p7 = scmp.ge.s32.totalorder %s4275_s27, 1 }
  0x12   : > { %s6039_s20 = scalar_select %p4414_p6, 1, 0 }
  0x13   : > { %p490_p8 = scmp.lt.s32.totalorder %s4275_s27, 3 }
  0x14   : > { %6040 = sst [smem:[#allocation10_spill]] %s6039_s20 }
  0x15   : > { %p491_p9 = pnand %p3115_p7, %p490_p8 }
  0x16   : > { %s6041_s23 = sld [smem:[#allocation12_spill]] (!%p491_p9)  ;;  %p541_p10 = scmp.lt.s32.totalorder (!%p491_p9), %s4393_s28, 1  ;;  %v4277_v7 = vmov (!%p491_p9), 0.0   ;;  %vm969_vm0 = vcmask (!%p491_p9), 1044480   ;;  %vm1107_vm1 = vcmask (!%p491_p9), 1043456   ;;  %vm603_vm2 = vcmask (!%p491_p9), 1046528  }
  0x17   : > { %494 = sbr.rel (%p491_p9) target bundleno = 2372 (0x944), region = 88  ;;  %684 = vmatprep.mubr.f32.mxu0 (!%p491_p9), %v4277_v7  ;;  %1307 = vmatprep.mubr.f32.mxu1 (!%p491_p9), %v4277_v7  ;;  %s6042_s27 = sld [smem:[#allocation11_spill]] (!%p491_p9)  ;;  %vm611_vm3 = vcmask (!%p491_p9), 785408   ;;  %vm831_vm4 = vcmask (!%p491_p9), 1045504   ;;  %vm4278_vm5 = vmmov (!%p491_p9), 1   ;;  %vm1224_vm7 = vcmask (!%p491_p9), 228352  }
  0x18   : > { %vm3768_vm6 = vmpackc.low (!%p491_p9), %vm1107_vm1, %vm4278_vm5  ;;  %vm1338_vm8 = vcmask (!%p491_p9), 1041408   ;;  %vm1378_vm9 = vcmask (!%p491_p9), 326656   ;;  %vm1619_vm10 = vcmask (!%p491_p9), 687104   ;;  %vm2147_vm12 = vcmask (!%p491_p9), 80896   ;;  %s539_s29 = sand.u32 (!%p491_p9), 1, %s4267_s25   ;;  %s6043_s16 = sld [smem:[#allocation13_spill]] (!%p491_p9) }
  0x19   : > { %vm3934_vm11 = vmpackc.low (!%p491_p9), %vm1338_vm8, %vm4278_vm5  ;;  %vm2241_vm13 = vcmask (!%p491_p9), 1042432   ;;  %vm2272_vm14 = vcmask (!%p491_p9), 261120   ;;  %vm4280_vm15 = vmmov (!%p491_p9), 0   ;;  %s3365_s26 = sshll.u32 (!%p491_p9), %s4393_s28, 4  ;;  %s540_s0 = scalar_lea.vmem (!%p491_p9), [#allocation2], %s539_s29 }
  0x1a   : > { %s3057_s24 = sshll.u32 (!%p491_p9), %s540_s0, 4  ;;  %s5963_s24 = int_to_ptr.vmem [resolvable:$true] %s3057_s24 }
  0x1b   : > { %s4213_s19 = scalar_lea.vmem (!%p491_p9), %s5963_s24, 16 }
  0x1c   : > { %v3119_v0 = vld [vmem:[%s6041_s23 + $0xc8] sm:$0xff] (!%p491_p9)  ;;  %v3121_v1 = vld [vmem:[%s6041_s23 + $0xd8] sm:$0xff] (!%p491_p9)  ;;  %v3118_v2 = vld [vmem:[%s6041_s23 + $0xc0] sm:$0xff] (!%p491_p9)  ;;  %p4214_p11 = scmp.ne.s32.totalorder (!%p491_p9), %s5963_s24, %s4213_s19 }
  0x1d   : > { %v3643_v3 = vpack.c.bf16 (!%p491_p9), %v3121_v1, %v3119_v0  ;;  %v3120_v4 = vld [vmem:[%s6041_s23 + $0xd0] sm:$0xff] (!%p491_p9)  ;;  %v3123_v5 = vld [vmem:[%s6041_s23 + $0xe8] sm:$0xff] (!%p491_p9)  ;;  %v3125_v6 = vld [vmem:[%s6041_s23 + $0xf8] sm:$0xff] (!%p491_p9) }
  0x1e   : > { %v3645_v8 = vpack.c.bf16 %v3120_v4, %v3118_v2  ;;  %v3647_v9 = vpack.c.bf16 %v3125_v6, %v3123_v5  ;;  %v3122_v10 = vld [vmem:[%s6041_s23 + $0xe0] sm:$0xff]  ;;  %v3124_v11 = vld [vmem:[%s6041_s23 + $0xf0] sm:$0xff]  ;;  %v3127_v12 = vld [vmem:[%s6041_s23 + $0x108] sm:$0xff]  ;;  %s542_s30 = scalar_select %p541_p10, %s4393_s28, 1 }
  0x1f   : > { %3644 = vmatprep.subr.bf16.mxu0 %v3643_v3  ;;  %v3129_v13 = vld [vmem:[%s6041_s23 + $0x118] sm:$0xff]  ;;  %v3649_v14 = vpack.c.bf16 %v3124_v11, %v3122_v10  ;;  %v3126_v16 = vld [vmem:[%s6041_s23 + $0x100] sm:$0xff]  ;;  %v3128_v17 = vld [vmem:[%s6041_s23 + $0x110] sm:$0xff]  ;;  %p4215_p12 = pnand %p4214_p11, %p4410_p5  ;;  %s4281_s28 = smov [#allocation2]  }
  0x20   : > { %3646 = vmatpush1.bf16.msra.mxu0 %v3645_v8  ;;  %s3368_s22 = sshll.u32 %s542_s30, 5  ;;  %v3651_v15 = vpack.c.bf16 %v3129_v13, %v3127_v12  ;;  %v3131_v18 = vld [vmem:[%s6041_s23 + $0x128] sm:$0xff]  ;;  %v3133_v19 = vld [vmem:[%s6041_s23 + $0x138] sm:$0xff]  ;;  %v3653_v20 = vpack.c.bf16 %v3128_v17, %v3126_v16  ;;  %v3130_v23 = vld [vmem:[%s6041_s23 + $0x120] sm:$0xff]  ;;  %s3045_s30 = scalar_lea.sflag [#allocation3], %s539_s29 }
  0x21   : > { %3648 = vmatprep.subr.bf16.mxu0 %v3647_v9  ;;  %s4463_s17 = scalar_lea.vmem %s6042_s27, %s3368_s22  ;;  %v3655_v22 = vpack.c.bf16 %v3133_v19, %v3131_v18  ;;  %v3132_v24 = vld [vmem:[%s6041_s23 + $0x130] sm:$0xff]  ;;  %v3135_v27 = vld [vmem:[%s6041_s23 + $0x148] sm:$0xff]  ;;  %v3137_v28 = vld [vmem:[%s6041_s23 + $0x158] sm:$0xff]  ;;  %p4216_p13 = pneg %p4215_p12 }
  0x22   : > { %v4472_v21 = vld [vmem:[%s4463_s17] sm:$0xff]  ;;  %v4481_v25 = vld [vmem:[%s4463_s17 + $0x8] sm:$0xff]  ;;  %v3657_v32 = vpack.c.bf16 %v3132_v24, %v3130_v23  ;;  %v3659_v33 = vpack.c.bf16 %v3137_v28, %v3135_v27  ;;  %v3136_v35 = vld [vmem:[%s6041_s23 + $0x150] sm:$0xff]  ;;  %s4217_s27 = sshll.u32 %s4281_s28, 4  ;;  %s4218_s27 = int_to_ptr.vmem [resolvable:$false] %s4217_s27 }
  0x23   : > { %v970_v26 = vrot.slane %v4472_v21, 3  ;;  %v971_v29 = vrot.slane %v4481_v25, 3  ;;  %v1108_v30 = vrot.slane %v4472_v21, 4  ;;  %v1109_v31 = vrot.slane %v4481_v25, 4  ;;  %v3134_v34 = vld [vmem:[%s6041_s23 + $0x140] sm:$0xff]  ;;  %v4500_v36 = vld [vmem:[%s4463_s17 + $0x10] sm:$0xff]  ;;  %p4220_p0 = scmp.lt.s32.totalorder %s5963_s24, %s4218_s27 }
  0x24   : > { %3650 = vmatpush1.bf16.msra.mxu0 %v3649_v14  ;;  %v3139_v39 = vld [vmem:[%s6041_s23 + $0x168] sm:$0xff]  ;;  %v3141_v40 = vld [vmem:[%s6041_s23 + $0x178] sm:$0xff]  ;;  %v973_v41 = vrot.slane %v4500_v36, 3  ;;  %v1111_v42 = vrot.slane %v4500_v36, 4  ;;  %v3661_v43 = vpack.c.bf16 %v3136_v35, %v3134_v34  ;;  %v3138_v46 = vld [vmem:[%s6041_s23 + $0x160] sm:$0xff]  ;;  %v604_v56 = vrot.slane %v4472_v21, 1 }
  0x25   : > { %3652 = vmatprep.subr.bf16.mxu0 %v3651_v15  ;;  %v4503_v37 = vsel %vm969_vm0, %v970_v26, %v971_v29  ;;  %v4506_v38 = vsel %vm1107_vm1, %v1108_v30, %v1109_v31  ;;  %v4517_v44 = vld [vmem:[%s4463_s17 + $0x18] sm:$0xff]  ;;  %v3663_v45 = vpack.c.bf16 %v3141_v40, %v3139_v39  ;;  %v3140_v47 = vld [vmem:[%s6041_s23 + $0x170] sm:$0xff]  ;;  %v551_v50 = vld [vmem:[%s6041_s23 + $0x8] sm:$0xff]  ;;  %v605_v57 = vrot.slane %v4481_v25, 1  ;;  %s6044_s17 = sld [smem:[#allocation14_spill]]  ;;  %s4219_s22 = scalar_lea.vmem %s4218_s27, 32 }
  0x26   : > { %v4526_v48 = vsel %vm969_vm0, %v971_v29, %v973_v41  ;;  %v975_v49 = vrot.slane %v4517_v44, 3  ;;  %v553_v51 = vld [vmem:[%s6041_s23 + $0x18] sm:$0xff]  ;;  %v4536_v52 = vsel %vm1107_vm1, %v1109_v31, %v1111_v42  ;;  %v1113_v54 = vrot.slane %v4517_v44, 4  ;;  %v550_v59 = vld [vmem:[%s6041_s23] sm:$0xff]  ;;  %v552_v60 = vld [vmem:[%s6041_s23 + $0x10] sm:$0xff]  ;;  %p4221_p1 = scmp.lt.s32.totalorder %s4219_s22, %s4213_s19 }
  0x27   : > { %v3665_v55 = vpack.c.bf16 %v3140_v47, %v3138_v46  ;;  %v3667_v58 = vpack.c.bf16 %v553_v51, %v551_v50  ;;  %v555_v62 = vld [vmem:[%s6041_s23 + $0x28] sm:$0xff]  ;;  %v557_v63 = vld [vmem:[%s6041_s23 + $0x38] sm:$0xff]  ;;  %v606_v0 = vsel %vm603_vm2, %v604_v56, %v605_v57  ;;  %v3669_v1 = vpack.c.bf16 %v552_v60, %v550_v59  ;;  %v554_v4 = vld [vmem:[%s6041_s23 + $0x20] sm:$0xff] }
  0x28   : > { %3654 = vmatpush1.bf16.msra.mxu0 %v3653_v20  ;;  %v4541_v53 = vsel %vm969_vm0, %v973_v41, %v975_v49  ;;  %v4555_v61 = vsel %vm1107_vm1, %v1111_v42, %v1113_v54  ;;  %v607_v2 = vrot.slane %v4500_v36, 1  ;;  %v3671_v3 = vpack.c.bf16 %v557_v63, %v555_v62  ;;  %v556_v5 = vld [vmem:[%s6041_s23 + $0x30] sm:$0xff]  ;;  %v559_v6 = vld [vmem:[%s6041_s23 + $0x48] sm:$0xff]  ;;  %v561_v8 = vld [vmem:[%s6041_s23 + $0x58] sm:$0xff]  ;;  %p4222_p2 = por %p4221_p1, %p4220_p0 }
  0x29   : > { %3656 = vmatprep.subr.bf16.mxu0 %v3655_v22  ;;  %v3673_v9 = vpack.c.bf16 %v556_v5, %v554_v4  ;;  %v609_v11 = vrot.slane %v4517_v44, 1  ;;  %v3675_v12 = vpack.c.bf16 %v561_v8, %v559_v6  ;;  %v558_v13 = vld [vmem:[%s6041_s23 + $0x40] sm:$0xff]  ;;  %v560_v14 = vld [vmem:[%s6041_s23 + $0x50] sm:$0xff]  ;;  %v563_v15 = vld [vmem:[%s6041_s23 + $0x68] sm:$0xff] }
  0x2a   : > { %v608_v10 = vsel %vm603_vm2, %v605_v57, %v607_v2  ;;  %v565_v16 = vld [vmem:[%s6041_s23 + $0x78] sm:$0xff]  ;;  %v3677_v17 = vpack.c.bf16 %v560_v14, %v558_v13  ;;  %v562_v20 = vld [vmem:[%s6041_s23 + $0x60] sm:$0xff]  ;;  %v564_v22 = vld [vmem:[%s6041_s23 + $0x70] sm:$0xff]  ;;  %p4223_p3 = pnand %p4222_p2, %p4216_p13 }
  0x2b   : > { %v610_v18 = vsel %vm603_vm2, %v607_v2, %v609_v11  ;;  %v3679_v19 = vpack.c.bf16 %v565_v16, %v563_v15  ;;  %v567_v23 = vld [vmem:[%s6041_s23 + $0x88] sm:$0xff]  ;;  %v569_v24 = vld [vmem:[%s6041_s23 + $0x98] sm:$0xff]  ;;  %v3681_v26 = vpack.c.bf16 %v564_v22, %v562_v20  ;;  %v566_v28 = vld [vmem:[%s6041_s23 + $0x80] sm:$0xff]  ;;  %s5961_s21 = scalar_lea.hbm %s6044_s17, %s3365_s26 }
  0x2c   : > { %3658 = vmatpush1.bf16.msra.mxu0 %v3657_v32  ;;  %v3683_v27 = vpack.c.bf16 %v569_v24, %v567_v23  ;;  %v568_v29 = vld [vmem:[%s6041_s23 + $0x90] sm:$0xff]  ;;  %v571_v30 = vld [vmem:[%s6041_s23 + $0xa8] sm:$0xff]  ;;  %v573_v31 = vld [vmem:[%s6041_s23 + $0xb8] sm:$0xff]  ;;  %v832_v23 = vrot.slane %v4472_v21, 2  ;;  %v833_v24 = vrot.slane %v4481_v25, 2 }
  0x2d   : > { %3660 = vmatprep.subr.bf16.mxu0 %v3659_v33  ;;  %v3685_v32 = vpack.c.bf16 %v568_v29, %v566_v28  ;;  %v3687_v33 = vpack.c.bf16 %v573_v31, %v571_v30  ;;  %v570_v34 = vld [vmem:[%s6041_s23 + $0xa0] sm:$0xff]  ;;  %v572_v35 = vld [vmem:[%s6041_s23 + $0xb0] sm:$0xff]  ;;  %v3151_v39 = vld [vmem:[%s6041_s23 + $0x188] sm:$0xff]  ;;  %v835_v31 = vrot.slane %v4500_v36, 2 }
  0x2e   : > { %v3153_v40 = vld [vmem:[%s6041_s23 + $0x198] sm:$0xff]  ;;  %v3689_v41 = vpack.c.bf16 %v572_v35, %v570_v34  ;;  %v3155_v46 = vld [vmem:[%s6041_s23 + $0x1a8] sm:$0xff]  ;;  %v3156_v56 = vld [vmem:[%s6041_s23 + $0x1b0] sm:$0xff] }
  0x2f   : > { %v3691_v42 = vpack.c.bf16 %v3153_v40, %v3151_v39  ;;  %v3157_v47 = vld [vmem:[%s6041_s23 + $0x1b8] sm:$0xff]  ;;  %v3159_v57 = vld [vmem:[%s6041_s23 + $0x1c8] sm:$0xff]  ;;  %v3158_v62 = vld [vmem:[%s6041_s23 + $0x1c0] sm:$0xff]  ;;  %v836_v40 = vsel %vm831_vm4, %v833_v24, %v835_v31 }
  0x30   : > { %3662 = vmatpush1.bf16.msra.mxu0 %v3661_v43  ;;  %v3150_v43 = vld [vmem:[%s6041_s23 + $0x180] sm:$0xff]  ;;  %v3695_v51 = vpack.c.bf16 %v3157_v47, %v3155_v46  ;;  %v3160_v63 = vld [vmem:[%s6041_s23 + $0x1d0] sm:$0xff]  ;;  %v3167_v6 = vld [vmem:[%s6041_s23 + $0x208] sm:$0xff] }
  0x31   : > { %3664 = vmatprep.subr.bf16.mxu0 %v3663_v45  ;;  %v3152_v45 = vld [vmem:[%s6041_s23 + $0x190] sm:$0xff]  ;;  %v3701_v2 = vpack.c.bf16 %v3160_v63, %v3158_v62  ;;  %v3162_v4 = vld [vmem:[%s6041_s23 + $0x1e0] sm:$0xff]  ;;  %v3169_v8 = vld [vmem:[%s6041_s23 + $0x218] sm:$0xff] }
  0x32   : > { %v3693_v50 = vpack.c.bf16 %v3152_v45, %v3150_v43  ;;  %v3164_v5 = vld [vmem:[%s6041_s23 + $0x1f0] sm:$0xff]  ;;  %v3171_v13 = vld [vmem:[%s6041_s23 + $0x228] sm:$0xff]  ;;  %v3173_v14 = vld [vmem:[%s6041_s23 + $0x238] sm:$0xff] }
  0x33   : > { %v3711_v16 = vpack.c.bf16 %v3173_v14, %v3171_v13  ;;  %v3181_v20 = vld [vmem:[%s6041_s23 + $0x258] sm:$0xff]  ;;  %v3180_v28 = vld [vmem:[%s6041_s23 + $0x250] sm:$0xff]  ;;  %v3183_v29 = vld [vmem:[%s6041_s23 + $0x268] sm:$0xff] }
  0x34   : > { %3666 = vmatpush1.bf16.msra.mxu0 %v3665_v55  ;;  %v3154_v55 = vld [vmem:[%s6041_s23 + $0x1a0] sm:$0xff]  ;;  %v3184_v34 = vld [vmem:[%s6041_s23 + $0x270] sm:$0xff]  ;;  %v3187_v35 = vld [vmem:[%s6041_s23 + $0x288] sm:$0xff] }
  0x35   : > { %3668 = vmatprep.subr.bf16.mxu0 %v3667_v58  ;;  %v3161_v58 = vld [vmem:[%s6041_s23 + $0x1d8] sm:$0xff]  ;;  %v3697_v59 = vpack.c.bf16 %v3156_v56, %v3154_v55  ;;  %v3186_v43 = vld [vmem:[%s6041_s23 + $0x280] sm:$0xff]  ;;  %v3188_v45 = vld [vmem:[%s6041_s23 + $0x290] sm:$0xff] }
  0x36   : > { %v3699_v60 = vpack.c.bf16 %v3161_v58, %v3159_v57  ;;  %v3189_v39 = vld [vmem:[%s6041_s23 + $0x298] sm:$0xff]  ;;  %v3191_v46 = vld [vmem:[%s6041_s23 + $0x2a8] sm:$0xff]  ;;  %v3190_v56 = vld [vmem:[%s6041_s23 + $0x2a0] sm:$0xff] }
  0x37   : > { %3142 = vmatmul.mubr.msk.f32.vlgmr.msra.gmra.mrb[0].mxu0 %vm611_vm3, %v606_v0  ;;  %v3163_v0 = vld [vmem:[%s6041_s23 + $0x1e8] sm:$0xff]  ;;  %v3193_v47 = vld [vmem:[%s6041_s23 + $0x2b8] sm:$0xff]  ;;  %v3192_v57 = vld [vmem:[%s6041_s23 + $0x2b0] sm:$0xff] }
  0x38   : > { %3670 = vmatpush1.bf16.msra.mxu0 %v3669_v1  ;;  %690 = vmatprep.mubr.f32.mxu0 %v4277_v7  ;;  %v3165_v1 = vld [vmem:[%s6041_s23 + $0x1f8] sm:$0xff]  ;;  %v3727_v55 = vpack.c.bf16 %v3193_v47, %v3191_v46  ;;  %v3195_v58 = vld [vmem:[%s6041_s23 + $0x2c8] sm:$0xff]  ;;  %v3194_v63 = vld [vmem:[%s6041_s23 + $0x2c0] sm:$0xff] }
  0x39   : > { %3672 = vmatprep.subr.bf16.mxu0 %v3671_v3  ;;  %v3703_v3 = vpack.c.bf16 %v3165_v1, %v3163_v0  ;;  %v3196_v0 = vld [vmem:[%s6041_s23 + $0x2d0] sm:$0xff]  ;;  %v3199_v1 = vld [vmem:[%s6041_s23 + $0x2e8] sm:$0xff] }
  0x3a   : > { %v3208_v13 = vld [vmem:[%s6041_s23 + $0x310] sm:$0xff]  ;;  %v3211_v14 = vld [vmem:[%s6041_s23 + $0x328] sm:$0xff] }
  0x3b   : > { %3143 = vmatmul.mubr.msk.f32.gmra.mrb[2].mxu0 %vm611_vm3, %v608_v10  ;;  %v3707_v10 = vpack.c.bf16 %v3169_v8, %v3167_v6  ;;  %v3200_v6 = vld [vmem:[%s6041_s23 + $0x2f0] sm:$0xff]  ;;  %v3207_v8 = vld [vmem:[%s6041_s23 + $0x308] sm:$0xff] }
  0x3c   : > { %3674 = vmatpush1.bf16.msra.mxu0 %v3673_v9  ;;  %696 = vmatprep.mubr.f32.mxu0 %v4277_v7  ;;  %v3705_v9 = vpack.c.bf16 %v3164_v5, %v3162_v4  ;;  %v3198_v5 = vld [vmem:[%s6041_s23 + $0x2e0] sm:$0xff] }
  0x3d   : > { %3676 = vmatprep.subr.bf16.mxu0 %v3675_v12  ;;  %v3168_v12 = vld [vmem:[%s6041_s23 + $0x210] sm:$0xff] }
  0x3f   : > { %3144 = vmatmul.mubr.msk.f32.gmra.mrb[4].mxu0 %vm611_vm3, %v610_v18  ;;  %v3172_v18 = vld [vmem:[%s6041_s23 + $0x230] sm:$0xff] }
  0x40   : > { %3678 = vmatpush1.bf16.msra.mxu0 %v3677_v17  ;;  %702 = vmatprep.mubr.f32.mxu0 %v4277_v7  ;;  %v3170_v17 = vld [vmem:[%s6041_s23 + $0x220] sm:$0xff] }
  0x41   : > { %3680 = vmatprep.subr.bf16.mxu0 %v3679_v19  ;;  %v3179_v19 = vld [vmem:[%s6041_s23 + $0x248] sm:$0xff]  ;;  %v3713_v22 = vpack.c.bf16 %v3172_v18, %v3170_v17  ;;  %v3210_v18 = vld [vmem:[%s6041_s23 + $0x320] sm:$0xff] }
  0x43   : > { %3145 = vmatmul.mubr.msk.f32.gmra.mrb[6].mxu0 %vm611_vm3, %v609_v11  ;;  %v3166_v11 = vld [vmem:[%s6041_s23 + $0x200] sm:$0xff] }
  0x44   : > { %3682 = vmatpush1.bf16.msra.mxu0 %v3681_v26  ;;  %781 = vmatprep.mubr.f32.mxu0 %v4277_v7  ;;  %v3709_v15 = vpack.c.bf16 %v3168_v12, %v3166_v11  ;;  %v3715_v26 = vpack.c.bf16 %v3181_v20, %v3179_v19  ;;  %v3206_v12 = vld [vmem:[%s6041_s23 + $0x300] sm:$0xff]  ;;  %v3212_v19 = vld [vmem:[%s6041_s23 + $0x330] sm:$0xff]  ;;  %v3215_v20 = vld [vmem:[%s6041_s23 + $0x348] sm:$0xff] }
  0x45   : > { %3684 = vmatprep.subr.bf16.mxu0 %v3683_v27  ;;  %v3178_v27 = vld [vmem:[%s6041_s23 + $0x240] sm:$0xff] }
  0x46   : > { %v3717_v30 = vpack.c.bf16 %v3180_v28, %v3178_v27  ;;  %v3216_v27 = vld [vmem:[%s6041_s23 + $0x350] sm:$0xff]  ;;  %v3219_v28 = vld [vmem:[%s6041_s23 + $0x368] sm:$0xff] }
  0x48   : > { %3686 = vmatpush1.bf16.msra.mxu0 %v3685_v32 }
  0x49   : > { %3688 = vmatprep.subr.bf16.mxu0 %v3687_v33  ;;  %v3182_v33 = vld [vmem:[%s6041_s23 + $0x260] sm:$0xff] }
  0x4c   : > { %3690 = vmatpush1.bf16.msra.mxu0 %v3689_v41  ;;  %v837_v41 = vrot.slane %v4517_v44, 2 }
  0x4d   : > { %3692 = vmatprep.subr.bf16.mxu0 %v3691_v42  ;;  %v3723_v42 = vpack.c.bf16 %v3189_v39, %v3187_v35  ;;  %v3224_v35 = vld [vmem:[%s6041_s23 + $0x390] sm:$0xff]  ;;  %v3227_v39 = vld [vmem:[%s6041_s23 + $0x3a8] sm:$0xff] }
  0x4f   : > { %3146 = vmatmul.mubr.msk.f32.vlgmr.msra.gmra.mrb[0].mxu0 %vm611_vm3, %v4472_v21  ;;  %v3185_v21 = vld [vmem:[%s6041_s23 + $0x278] sm:$0xff] }
  0x50   : > { %3694 = vmatpush1.bf16.msra.mxu0 %v3693_v50  ;;  %787 = vmatprep.mubr.f32.mxu0 %v4277_v7  ;;  %v3719_v32 = vpack.c.bf16 %v3185_v21, %v3183_v29  ;;  %v3725_v50 = vpack.c.bf16 %v3188_v45, %v3186_v43 }
  0x51   : > { %3696 = vmatprep.subr.bf16.mxu0 %v3695_v51  ;;  %v838_v51 = vsel %vm831_vm4, %v835_v31, %v837_v41  ;;  %v3223_v31 = vld [vmem:[%s6041_s23 + $0x388] sm:$0xff] }
  0x53   : > { %3147 = vmatmul.mubr.msk.f32.gmra.mrb[2].mxu0 %vm611_vm3, %v4481_v25  ;;  %v834_v25 = vsel %vm831_vm4, %v832_v23, %v833_v24  ;;  %v3745_v23 = vpack.c.bf16 %v3212_v19, %v3210_v18  ;;  %v1370_v18 = vld [vmem:[%s6006_s3 + $0x68] sm:$0xff] }
  0x54   : > { %3698 = vmatpush1.bf16.msra.mxu0 %v3697_v59  ;;  %793 = vmatprep.mubr.f32.mxu0 %v4277_v7  ;;  %v3197_v59 = vld [vmem:[%s6041_s23 + $0x2d8] sm:$0xff] }
  0x55   : > { %3700 = vmatprep.subr.bf16.mxu0 %v3699_v60  ;;  %v3729_v60 = vpack.c.bf16 %v3192_v57, %v3190_v56  ;;  %v3731_v62 = vpack.c.bf16 %v3197_v59, %v3195_v58  ;;  %v1358_v57 = vld [vmem:[%s6006_s3 + $0x8] sm:$0xff]  ;;  %v1220_v58 = vld [vmem:[%s6005_s2] sm:$0xff] }
  0x57   : > { %3148 = vmatmul.mubr.msk.f32.gmra.mrb[4].mxu0 %vm611_vm3, %v4500_v36  ;;  %v3721_v36 = vpack.c.bf16 %v3184_v34, %v3182_v33  ;;  %v3222_v34 = vld [vmem:[%s6041_s23 + $0x380] sm:$0xff] }
  0x58   : > { %3702 = vmatpush1.bf16.msra.mxu0 %v3701_v2  ;;  %799 = vmatprep.mubr.f32.mxu0 %v4277_v7  ;;  %v3201_v2 = vld [vmem:[%s6041_s23 + $0x2f8] sm:$0xff] }
  0x59   : > { %3704 = vmatprep.subr.bf16.mxu0 %v3703_v3  ;;  %v3733_v3 = vpack.c.bf16 %v3196_v0, %v3194_v63  ;;  %v3735_v4 = vpack.c.bf16 %v3201_v2, %v3199_v1  ;;  %v1360_v63 = vld [vmem:[%s6006_s3 + $0x18] sm:$0xff]  ;;  %v1221_v0 = vld [vmem:[%s6005_s2 + $0x8] sm:$0xff]  ;;  %v1361_v2 = vld [vmem:[%s6006_s3 + $0x20] sm:$0xff] }
  0x5b   : > { %3149 = vmatmul.mubr.msk.f32.gmra.mrb[6].mxu0 %vm611_vm3, %v4517_v44 }
  0x5c   : > { %3706 = vmatpush1.bf16.msra.mxu0 %v3705_v9  ;;  %911 = vmatprep.mubr.f32.mxu0 %v4277_v7  ;;  %v3209_v9 = vld [vmem:[%s6041_s23 + $0x318] sm:$0xff] }
  0x5d   : > { %3708 = vmatprep.subr.bf16.mxu0 %v3707_v10  ;;  %v3737_v10 = vpack.c.bf16 %v3200_v6, %v3198_v5  ;;  %v3739_v11 = vpack.c.bf16 %v3209_v9, %v3207_v8  ;;  %v1363_v6 = vld [vmem:[%s6006_s3 + $0x30] sm:$0xff]  ;;  %v1364_v8 = vld [vmem:[%s6006_s3 + $0x38] sm:$0xff] }
  0x5e   : > { %v1223_v9 = vld [vmem:[%s6005_s2 + $0x18] sm:$0xf] }
  0x60   : > { %3710 = vmatpush1.bf16.msra.mxu0 %v3709_v15  ;;  %v3213_v15 = vld [vmem:[%s6041_s23 + $0x338] sm:$0xff] }
  0x61   : > { %3712 = vmatprep.subr.bf16.mxu0 %v3711_v16  ;;  %v3741_v16 = vpack.c.bf16 %v3208_v13, %v3206_v12  ;;  %v3743_v17 = vpack.c.bf16 %v3213_v15, %v3211_v14  ;;  %v1366_v12 = vld [vmem:[%s6006_s3 + $0x48] sm:$0xff]  ;;  %v1367_v14 = vld [vmem:[%s6006_s3 + $0x50] sm:$0xff]  ;;  %v1368_v15 = vld [vmem:[%s6006_s3 + $0x58] sm:$0xff] }
  0x64   : > { %3714 = vmatpush1.bf16.msra.mxu0 %v3713_v22  ;;  %v3217_v22 = vld [vmem:[%s6041_s23 + $0x358] sm:$0xff] }
  0x65   : > { %3716 = vmatprep.subr.bf16.mxu0 %v3715_v26  ;;  %v3747_v24 = vpack.c.bf16 %v3217_v22, %v3215_v20  ;;  %v3214_v26 = vld [vmem:[%s6041_s23 + $0x340] sm:$0xff]  ;;  %v1371_v20 = vld [vmem:[%s6006_s3 + $0x70] sm:$0xff]  ;;  %v1372_v22 = vld [vmem:[%s6006_s3 + $0x78] sm:$0xff] }
  0x66   : > { %v3749_v29 = vpack.c.bf16 %v3216_v27, %v3214_v26  ;;  %v1374_v26 = vld [vmem:[%s6006_s3 + $0x88] sm:$0xff] }
  0x67   : > { %3174 = vmatmul.mubr.msk.f32.vlgmr.msra.gmra.mrb[0].mxu0 %vm611_vm3, %v834_v25  ;;  %v3218_v25 = vld [vmem:[%s6041_s23 + $0x360] sm:$0xff] }
  0x68   : > { %3718 = vmatpush1.bf16.msra.mxu0 %v3717_v30  ;;  %917 = vmatprep.mubr.f32.mxu0 %v4277_v7  ;;  %v3220_v30 = vld [vmem:[%s6041_s23 + $0x370] sm:$0xff] }
  0x69   : > { %3720 = vmatprep.subr.bf16.mxu0 %v3719_v32  ;;  %v3753_v32 = vpack.c.bf16 %v3220_v30, %v3218_v25 }
  0x6b   : > { %3175 = vmatmul.mubr.msk.f32.gmra.mrb[2].mxu0 %vm611_vm3, %v836_v40 }
  0x6c   : > { %3722 = vmatpush1.bf16.msra.mxu0 %v3721_v36  ;;  %923 = vmatprep.mubr.f32.mxu0 %v4277_v7  ;;  %v3757_v36 = vpack.c.bf16 %v3224_v35, %v3222_v34 }
  0x6d   : > { %3724 = vmatprep.subr.bf16.mxu0 %v3723_v42  ;;  %v3228_v42 = vld [vmem:[%s6041_s23 + $0x3b0] sm:$0xff] }
  0x6f   : > { %3176 = vmatmul.mubr.msk.f32.gmra.mrb[4].mxu0 %vm611_vm3, %v838_v51 }
  0x70   : > { %3726 = vmatpush1.bf16.msra.mxu0 %v3725_v50  ;;  %929 = vmatprep.mubr.f32.mxu0 %v4277_v7 }
  0x71   : > { %3728 = vmatprep.subr.bf16.mxu0 %v3727_v55 }
  0x73   : > { %3177 = vmatmul.mubr.msk.f32.gmra.mrb[6].mxu0 %vm611_vm3, %v837_v41  ;;  %v3226_v41 = vld [vmem:[%s6041_s23 + $0x3a0] sm:$0xff] }
  0x74   : > { %3730 = vmatpush1.bf16.msra.mxu0 %v3729_v60  ;;  %1049 = vmatprep.mubr.f32.mxu0 %v4277_v7  ;;  %v3761_v43 = vpack.c.bf16 %v3228_v42, %v3226_v41  ;;  %v4279_v60 = vmov 0.0|0.0  }
  0x75   : > { %3732 = vmatprep.subr.bf16.mxu0 %v3731_v62  ;;  %v1359_v62 = vld [vmem:[%s6006_s3 + $0x10] sm:$0xff] }
  0x76   : > { %v3777_v1 = vpack.c.bf16 %v1360_v63, %v1359_v62  ;;  %v1466_v62 = vld [vmem:[%s6007_s4 + $0x30] sm:$0xff]  ;;  %v1467_v63 = vld [vmem:[%s6007_s4 + $0x38] sm:$0xff] }
  0x78   : > { %3734 = vmatpush1.bf16.msra.mxu0 %v3733_v3  ;;  %v1362_v3 = vld [vmem:[%s6006_s3 + $0x28] sm:$0xff] }
  0x79   : > { %3736 = vmatprep.subr.bf16.mxu0 %v3735_v4  ;;  %v1222_v4 = vld [vmem:[%s6005_s2 + $0x10] sm:$0xff]  ;;  %v3780_v5 = vpack.c.bf16 %v1362_v3, %v1361_v2  ;;  %v1469_v2 = vld [vmem:[%s6007_s4 + $0x48] sm:$0xff] }
  0x7c   : > { %3738 = vmatpush1.bf16.msra.mxu0 %v3737_v10  ;;  %v3783_v10 = vpack.c.bf16 %v1364_v8, %v1363_v6  ;;  %v1472_v8 = vld [vmem:[%s6007_s4 + $0x60] sm:$0xff] }
  0x7d   : > { %3740 = vmatprep.subr.bf16.mxu0 %v3739_v11  ;;  %v1365_v11 = vld [vmem:[%s6006_s3 + $0x40] sm:$0xff] }
  0x7e   : > { %v3786_v13 = vpack.c.bf16 %v1366_v12, %v1365_v11  ;;  %v1474_v11 = vld [vmem:[%s6007_s4 + $0x70] sm:$0xff]  ;;  %v1475_v12 = vld [vmem:[%s6007_s4 + $0x78] sm:$0xff] }
  0x7f   : > { %3202 = vmatmul.mubr.msk.f32.vlgmr.msra.gmra.mrb[0].mxu0 %vm611_vm3, %v4503_v37  ;;  %v3221_v37 = vld [vmem:[%s6041_s23 + $0x378] sm:$0xff] }
  0x80   : > { %3742 = vmatpush1.bf16.msra.mxu0 %v3741_v16  ;;  %1055 = vmatprep.mubr.f32.mxu0 %v4277_v7  ;;  %v3751_v21 = vpack.c.bf16 %v3221_v37, %v3219_v28  ;;  %v3789_v16 = vpack.c.bf16 %v1368_v15, %v1367_v14  ;;  %v1375_v28 = vld [vmem:[%s6006_s3 + $0x90] sm:$0xff]  ;;  %v1376_v37 = vld [vmem:[%s6006_s3 + $0x98] sm:$0xff]  ;;  %v1476_v14 = vld [vmem:[%s6007_s4 + $0x80] sm:$0xff] }
  0x81   : > { %3744 = vmatprep.subr.bf16.mxu0 %v3743_v17  ;;  %v1369_v17 = vld [vmem:[%s6006_s3 + $0x60] sm:$0xff]  ;;  %v1477_v15 = vld [vmem:[%s6007_s4 + $0x88] sm:$0xff] }
  0x82   : > { %v3792_v19 = vpack.c.bf16 %v1370_v18, %v1369_v17  ;;  %v1478_v17 = vld [vmem:[%s6007_s4 + $0x90] sm:$0xff]  ;;  %v1479_v18 = vld [vmem:[%s6007_s4 + $0x98] sm:$0xff] }
  0x83   : > { %3203 = vmatmul.mubr.msk.f32.gmra.mrb[2].mxu0 %vm611_vm3, %v4526_v48  ;;  %v3225_v48 = vld [vmem:[%s6041_s23 + $0x398] sm:$0xff] }
  0x84   : > { %3746 = vmatpush1.bf16.msra.mxu0 %v3745_v23  ;;  %1061 = vmatprep.mubr.f32.mxu0 %v4277_v7  ;;  %v3755_v33 = vpack.c.bf16 %v3225_v48, %v3223_v31  ;;  %v3795_v23 = vpack.c.bf16 %v1372_v22, %v1371_v20  ;;  %v1480_v20 = vld [vmem:[%s6007_s4 + $0xa0] sm:$0xff]  ;;  %v3246_v22 = vld [vmem:[%s6009_s6 + $0xb8] sm:$0xff] }
  0x85   : > { %3748 = vmatprep.subr.bf16.mxu0 %v3747_v24  ;;  %v1373_v24 = vld [vmem:[%s6006_s3 + $0x80] sm:$0xff] }
  0x86   : > { %v3798_v27 = vpack.c.bf16 %v1374_v26, %v1373_v24  ;;  %v3245_v24 = vld [vmem:[%s6009_s6 + $0xb0] sm:$0xff] }
  0x87   : > { %3204 = vmatmul.mubr.msk.f32.gmra.mrb[4].mxu0 %vm611_vm3, %v4541_v53  ;;  %v3229_v53 = vld [vmem:[%s6041_s23 + $0x3b8] sm:$0xff] }
  0x88   : > { %3750 = vmatpush1.bf16.msra.mxu0 %v3749_v29  ;;  %1067 = vmatprep.mubr.f32.mxu0 %v4277_v7  ;;  %v3759_v40 = vpack.c.bf16 %v3229_v53, %v3227_v39  ;;  %v3801_v29 = vpack.c.bf16 %v1376_v37, %v1375_v28  ;;  %v3250_v28 = vld [vmem:[%s6009_s6 + $0xd8] sm:$0xff]  ;;  %v3252_v37 = vld [vmem:[%s6009_s6 + $0xe8] sm:$0xff] }
  0x89   : > { %3752 = vmatprep.subr.bf16.mxu0 %v3751_v21  ;;  %v1377_v21 = vld [vmem:[%s6006_s3 + $0xa0] sm:$0xff] }
  0x8b   : > { %3205 = vmatmul.mubr.msk.f32.gmra.mrb[6].mxu0 %vm611_vm3, %v975_v49 }
  0x8c   : > { %3754 = vmatpush1.bf16.msra.mxu0 %v3753_v32  ;;  %1187 = vmatprep.mubr.f32.mxu0 %v4277_v7 }
  0x8d   : > { %3756 = vmatprep.subr.bf16.mxu0 %v3755_v33 }
  0x90   : > { %3758 = vmatpush1.bf16.msra.mxu0 %v3757_v36  ;;  %v1460_v36 = vld [vmem:[%s6007_s4] sm:$0xff] }
  0x91   : > { %3760 = vmatprep.subr.bf16.mxu0 %v3759_v40  ;;  %v1461_v40 = vld [vmem:[%s6007_s4 + $0x8] sm:$0xff] }
  0x94   : > { %3762 = vmatpush1.bf16.msra.mxu0 %v3761_v43 }
  0x97   : > { %3230 = vmatmul.mubr.msk.f32.vlgmr.msra.gmra.mrb[0].mxu0 %vm611_vm3, %v4506_v38 }
  0x98   : > { %1193 = vmatprep.mubr.f32.mxu0 %v4277_v7 }
  0x9b   : > { %3231 = vmatmul.mubr.msk.f32.gmra.mrb[2].mxu0 %vm611_vm3, %v4536_v52 }
  0x9c   : > { %1199 = vmatprep.mubr.f32.mxu0 %v4277_v7 }
  0x9f   : > { %3232 = vmatmul.mubr.msk.f32.gmra.mrb[4].mxu0 %vm611_vm3, %v4555_v61 }
  0xa0   : > { %1205 = vmatprep.mubr.f32.mxu0 %v4277_v7 }
  0xa3   : > { %3233 = vmatmul.mubr.msk.f32.gmra.mrb[6].mxu0 %vm611_vm3, %v1113_v54  ;;  %v1357_v54 = vld [vmem:[%s6006_s3] sm:$0xff] }
  0xa4   : > { %2224 = vmatprep.mubr.f32.mxu0 %v4277_v7  ;;  %v3774_v59 = vpack.c.bf16 %v1358_v57, %v1357_v54  ;;  %v1464_v57 = vld [vmem:[%s6007_s4 + $0x20] sm:$0xff] }
 0x16a   : > { %v1189_v49 = vpop.f32.mrb[0].mxu0 }
 0x16b   : > { %v1191_v38 = vpop.f32.mrb[1].mxu0 }
 0x16e   : > { %v1195_v45 = vpop.f32.mrb[2].mxu0 }
 0x16f   : > { %v3765_v46 = vpack.c.bf16 %v1195_v45, %v1189_v49  ;;  %v1197_v47 = vpop.f32.mrb[3].mxu0 }
 0x170   : > { %v3763_v50 = vpack.c.bf16 %v1197_v47, %v1191_v38  ;;  %v3804_v47 = vpack.c.bf16 %v1461_v40, %v1460_v36  ;;  %v3260_v36 = vld [vmem:[%s6009_s6 + $0x128] sm:$0xff] }
 0x172   : > { %v1201_v52 = vpop.f32.mrb[4].mxu0  ;;  %3764 = vmatprep.subr.bf16.mxu1 %v3763_v50 }
 0x173   : > { %v1203_v51 = vpop.f32.mrb[5].mxu0  ;;  %3766 = vmatpush1.bf16.msra.mxu1 %v3765_v46 }
 0x176   : > { %v1207_v55 = vpop.f32.mrb[6].mxu0 }
 0x177   : > { %v3770_v61 = vpack.c.bf16 %v1207_v55, %v1201_v52  ;;  %v1209_v56 = vpop.f32.mrb[7].mxu0  ;;  %v1462_v52 = vld [vmem:[%s6007_s4 + $0x10] sm:$0xff] }
 0x178   : > { %v3767_v44 = vpack.c.bf16 %v1209_v56, %v1203_v51  ;;  %v1463_v51 = vld [vmem:[%s6007_s4 + $0x18] sm:$0xff] }
 0x179   : > { %v3807_v54 = vpack.c.bf16 %v1463_v51, %v1462_v52  ;;  %v3266_v52 = vld [vmem:[%s6009_s6 + $0x158] sm:$0xf]  ;;  %v3265_v51 = vld [vmem:[%s6009_s6 + $0x150] sm:$0xf] }
 0x17a   : > { %3769 = vmatprep.subr.msk.bf16.mxu1 %vm3768_vm6, %v3767_v44 }
 0x17b   : > { %3772 = vmatpush1.bf16.msk.msra.mxu1 %vm3768_vm6, %v3770_v61 }
 0x17c   : > { %3773 = vmatprep.subr.bf16.mxu1 %v4279_v60 }
 0x17e   : > { %3236 = vmatmul.mubr.msk.f32.vlgmr.msra.gmra.mrb[0].mxu1 %vm1224_vm7, %v1220_v58  ;;  %v1465_v58 = vld [vmem:[%s6007_s4 + $0x28] sm:$0xff] }
 0x17f   : > { %1313 = vmatprep.mubr.f32.mxu1 %v4277_v7  ;;  %3775 = vmatpush1.bf16.msra.mxu1 %v3774_v59  ;;  %v3810_v59 = vpack.c.bf16 %v1465_v58, %v1464_v57 }
 0x180   : > { %3776 = vmatprep.subr.bf16.mxu1 %v4279_v60 }
 0x182   : > { %3237 = vmatmul.mubr.msk.f32.gmra.mrb[2].mxu1 %vm1224_vm7, %v1221_v0  ;;  %v3813_v0 = vpack.c.bf16 %v1467_v63, %v1466_v62  ;;  %v3244_v62 = vld [vmem:[%s6008_s5] ss:$0 sm:$0xff] }
 0x183   : > { %1319 = vmatprep.mubr.f32.mxu1 %v4277_v7  ;;  %3778 = vmatpush1.bf16.msra.mxu1 %v3777_v1  ;;  %v1468_v1 = vld [vmem:[%s6007_s4 + $0x40] sm:$0xff] }
 0x184   : > { %3779 = vmatprep.subr.bf16.mxu1 %v4279_v60  ;;  %v3816_v3 = vpack.c.bf16 %v1469_v2, %v1468_v1 }
 0x186   : > { %3238 = vmatmul.mubr.msk.f32.gmra.mrb[4].mxu1 %vm1224_vm7, %v1222_v4  ;;  %v1470_v4 = vld [vmem:[%s6007_s4 + $0x50] sm:$0xff] }
 0x187   : > { %1325 = vmatprep.mubr.f32.mxu1 %v4277_v7  ;;  %3781 = vmatpush1.bf16.msra.mxu1 %v3780_v5  ;;  %v1471_v5 = vld [vmem:[%s6007_s4 + $0x58] sm:$0xff] }
 0x188   : > { %3782 = vmatprep.subr.bf16.mxu1 %v4279_v60  ;;  %v3819_v6 = vpack.c.bf16 %v1471_v5, %v1470_v4 }
 0x18a   : > { %3239 = vmatmul.mubr.msk.f32.gmra.mrb[6].mxu1 %vm1224_vm7, %v1223_v9  ;;  %v1473_v9 = vld [vmem:[%s6007_s4 + $0x68] sm:$0xff] }
 0x18b   : > { %3784 = vmatpush1.bf16.msra.mxu1 %v3783_v10  ;;  %v3822_v10 = vpack.c.bf16 %v1473_v9, %v1472_v8  ;;  %v1571_v8 = vld [vmem:[%s6009_s6 + $0x10] sm:$0xff] }
 0x18c   : > { %3785 = vmatprep.subr.bf16.mxu1 %v4279_v60 }
 0x18f   : > { %3787 = vmatpush1.bf16.msra.mxu1 %v3786_v13  ;;  %v3825_v13 = vpack.c.bf16 %v1475_v12, %v1474_v11  ;;  %v1574_v12 = vld [vmem:[%s6009_s6 + $0x28] sm:$0xff] }
 0x190   : > { %3788 = vmatprep.subr.bf16.mxu1 %v4279_v60 }
 0x193   : > { %3790 = vmatpush1.bf16.msra.mxu1 %v3789_v16  ;;  %v3828_v16 = vpack.c.bf16 %v1477_v15, %v1476_v14 }
 0x194   : > { %3791 = vmatprep.subr.bf16.mxu1 %v4279_v60 }
 0x197   : > { %3793 = vmatpush1.bf16.msra.mxu1 %v3792_v19  ;;  %v3831_v19 = vpack.c.bf16 %v1479_v18, %v1478_v17 }
 0x198   : > { %3794 = vmatprep.subr.bf16.mxu1 %v4279_v60 }
 0x19b   : > { %3796 = vmatpush1.bf16.msra.mxu1 %v3795_v23  ;;  %v3248_v23 = vld [vmem:[%s6009_s6 + $0xc8] sm:$0xff] }
 0x19c   : > { %3797 = vmatprep.subr.bf16.mxu1 %v4279_v60  ;;  %v3833_v26 = vpack.c.bf16 %v3248_v23, %v3246_v22 }
 0x19f   : > { %3799 = vmatpush1.bf16.msra.mxu1 %v3798_v27  ;;  %v3247_v27 = vld [vmem:[%s6009_s6 + $0xc0] sm:$0xff] }
 0x1a0   : > { %3800 = vmatprep.subr.bf16.mxu1 %v4279_v60 }
 0x1a3   : > { %3802 = vmatpush1.bf16.msra.mxu1 %v3801_v29  ;;  %v3835_v29 = vpack.c.bf16 %v3247_v27, %v3245_v24  ;;  %v1573_v24 = vld [vmem:[%s6009_s6 + $0x20] sm:$0xff] }
 0x1a4   : > { %1425 = vmatprep.subr.mxu1 %v4277_v7 }
 0x1a7   : > { %1426 = vmatpush1.msra.mxu1 %v1377_v21  ;;  %v3837_v21 = vpack.c.bf16 %v3252_v37, %v3250_v28  ;;  %v1578_v28 = vld [vmem:[%s6009_s6 + $0x48] sm:$0xff]  ;;  %v1580_v37 = vld [vmem:[%s6009_s6 + $0x58] sm:$0xff] }
 0x1a8   : > { %3803 = vmatprep.subr.bf16.mxu1 %v4279_v60 }
 0x251   : > { %v1309_v25 = vpop.f32.mrb[0].mxu1 }
 0x252   : > { %v1311_v30 = vpop.f32.mrb[1].mxu1 }
 0x255   : > { %v1315_v31 = vpop.f32.mrb[2].mxu1 }
 0x256   : > { %v1317_v48 = vpop.f32.mrb[3].mxu1  ;;  %v1339_v33 = vrot.slane %v1315_v31, 6 }
 0x257   : > { %v1342_v39 = vrot.slane %v1317_v48, 6 }
 0x259   : > { %v1321_v32 = vpop.f32.mrb[4].mxu1 }
 0x25a   : > { %v1340_v34 = vrot.slane %v1321_v32, 6  ;;  %v1323_v35 = vpop.f32.mrb[5].mxu1 }
 0x25b   : > { %v1343_v53 = vrot.slane %v1323_v35, 6  ;;  %v3255_v35 = vld [vmem:[%s6009_s6 + $0x100] sm:$0xff] }
 0x25c   : > { %v1341_v41 = vsel %vm1338_vm8, %v1339_v33, %v1340_v34 }
 0x25d   : > { %v5002_v42 = vmax.f32 %v1309_v25, %v1341_v41  ;;  %v1344_v43 = vsel %vm1338_vm8, %v1342_v39, %v1343_v53  ;;  %v1327_v49 = vpop.f32.mrb[6].mxu1  ;;  %v3249_v25 = vld [vmem:[%s6009_s6 + $0xd0] sm:$0xff] }
 0x25e   : > { %v1354_v38 = vmax.f32 %v1311_v30, %v1344_v43  ;;  %v1345_v45 = vrot.slane %v1327_v49, 6  ;;  %v1329_v46 = vpop.f32.mrb[7].mxu1  ;;  %v3251_v30 = vld [vmem:[%s6009_s6 + $0xe0] sm:$0xff]  ;;  %v3257_v41 = vld [vmem:[%s6009_s6 + $0x110] sm:$0xff]  ;;  %v3262_v49 = vld [vmem:[%s6009_s6 + $0x138] sm:$0xff] }
 0x25f   : > { %v1347_v50 = vrot.slane %v1329_v46, 6  ;;  %v3839_v32 = vpack.c.bf16 %v3251_v30, %v3249_v25  ;;  %v3261_v46 = vld [vmem:[%s6009_s6 + $0x130] sm:$0xff] }
 0x260   : > { %3240 = vmatprep.mubr.msk.f32.mxu1 %vm1378_vm9, %v1354_v38  ;;  %v1346_v55 = vsel %vm1338_vm8, %v1340_v34, %v1345_v45  ;;  %v3253_v34 = vld [vmem:[%s6009_s6 + $0xf0] sm:$0xff] }
 0x261   : > { %v1348_v61 = vsel %vm1338_vm8, %v1343_v53, %v1347_v50  ;;  %1450 = vmatmul.mubr.f32.vlgmr.msra.gmra.mrb[8].mxu1 %v5002_v42  ;;  %v1355_v56 = vmax.f32 %v1315_v31, %v1346_v55  ;;  %v3254_v31 = vld [vmem:[%s6009_s6 + $0xf8] sm:$0xff]  ;;  %v3843_v39 = vpack.c.bf16 %v3255_v35, %v3253_v34  ;;  %v1570_v55 = vld [vmem:[%s6009_s6 + $0x8] sm:$0xff] }
 0x262   : > { %v1356_v44 = vmax.f32 %v1317_v48, %v1348_v61  ;;  %3805 = vmatpush1.bf16.msra.mxu1 %v3804_v47  ;;  %v3256_v48 = vld [vmem:[%s6009_s6 + $0x108] sm:$0xff]  ;;  %v3258_v53 = vld [vmem:[%s6009_s6 + $0x118] sm:$0xff]  ;;  %v3263_v47 = vld [vmem:[%s6009_s6 + $0x140] sm:$0xff] }
 0x263   : > { %3806 = vmatprep.subr.bf16.mxu1 %v4279_v60  ;;  %v3841_v33 = vpack.c.bf16 %v3256_v48, %v3254_v31  ;;  %v3845_v40 = vpack.c.bf16 %v3260_v36, %v3258_v53  ;;  %v3851_v50 = vpack.c.bf16 %v3263_v47, %v3261_v46  ;;  %v1572_v61 = vld [vmem:[%s6009_s6 + $0x18] sm:$0xff]  ;;  %v3861_v31 = vpack.c.bf16 %v1580_v37, %v1578_v28  ;;  %v1577_v48 = vld [vmem:[%s6009_s6 + $0x40] sm:$0xff]  ;;  %v1583_v36 = vld [vmem:[%s6009_s6 + $0x70] sm:$0xff] }
 0x264   : > { %3241 = vmatprep.mubr.msk.f32.mxu1 %vm1378_vm9, %v1356_v44  ;;  %v1584_v34 = vld [vmem:[%s6009_s6 + $0x78] sm:$0xff]  ;;  %v1581_v53 = vld [vmem:[%s6009_s6 + $0x60] sm:$0xff]  ;;  %v1590_v46 = vld [vmem:[%s6009_s6 + $0xa8] sm:$0xf] }
 0x265   : > { %1455 = vmatmul.mubr.f32.gmra.mrb[10].mxu1 %v1355_v56  ;;  %v3276_v47 = vld [vmem:[%s6009_s6 + $0x168] sm:$0xff]  ;;  %v3303_v28 = vld [vmem:[%s6009_s6 + $0x220] sm:$0xff]  ;;  %v3306_v37 = vld [vmem:[%s6009_s6 + $0x238] sm:$0xff] }
 0x266   : > { %3808 = vmatpush1.bf16.msra.mxu1 %v3807_v54  ;;  %3242 = vmatprep.mubr.msk.f32.mxu1 %vm1378_vm9, %v1354_v38  ;;  %v3264_v38 = vld [vmem:[%s6009_s6 + $0x148] sm:$0xff] }
 0x267   : > { %3809 = vmatprep.subr.bf16.mxu1 %v4279_v60  ;;  %v3849_v45 = vpack.c.bf16 %v3264_v38, %v3262_v49  ;;  %v1585_v49 = vld [vmem:[%s6009_s6 + $0x80] sm:$0xff]  ;;  %v1587_v38 = vld [vmem:[%s6009_s6 + $0x90] sm:$0xff] }
 0x26a   : > { %3811 = vmatpush1.bf16.msra.mxu1 %v3810_v59 }
 0x26b   : > { %3812 = vmatprep.subr.bf16.mxu1 %v4279_v60 }
 0x26e   : > { %3814 = vmatpush1.bf16.msra.mxu1 %v3813_v0 }
 0x26f   : > { %3815 = vmatprep.subr.bf16.mxu1 %v4279_v60 }
 0x272   : > { %3817 = vmatpush1.bf16.msra.mxu1 %v3816_v3 }
 0x273   : > { %3818 = vmatprep.subr.bf16.mxu1 %v4279_v60 }
 0x276   : > { %3820 = vmatpush1.bf16.msra.mxu1 %v3819_v6  ;;  %v1569_v6 = vld [vmem:[%s6009_s6] sm:$0xff] }
 0x277   : > { %3821 = vmatprep.subr.bf16.mxu1 %v4279_v60  ;;  %v3855_v11 = vpack.c.bf16 %v1571_v8, %v1569_v6 }
 0x27a   : > { %3823 = vmatpush1.bf16.msra.mxu1 %v3822_v10 }
 0x27b   : > { %3824 = vmatprep.subr.bf16.mxu1 %v4279_v60 }
 0x27e   : > { %3826 = vmatpush1.bf16.msra.mxu1 %v3825_v13  ;;  %v1576_v13 = vld [vmem:[%s6009_s6 + $0x38] sm:$0xff] }
 0x27f   : > { %3827 = vmatprep.subr.bf16.mxu1 %v4279_v60  ;;  %v3857_v23 = vpack.c.bf16 %v1576_v13, %v1574_v12  ;;  %v3292_v12 = vld [vmem:[%s6009_s6 + $0x1e8] sm:$0xff]  ;;  %v3294_v13 = vld [vmem:[%s6009_s6 + $0x1f8] sm:$0xff] }
 0x282   : > { %3829 = vmatpush1.bf16.msra.mxu1 %v3828_v16 }
 0x283   : > { %3830 = vmatprep.subr.bf16.mxu1 %v4279_v60 }
 0x286   : > { %3832 = vmatpush1.bf16.msra.mxu1 %v3831_v19 }
 0x287   : > { %1521 = vmatprep.subr.mxu1 %v4277_v7 }
 0x28a   : > { %1522 = vmatpush1.msra.mxu1 %v1480_v20 }
 0x28b   : > { %1546 = vmatmul.mubr.f32.vlgmr.msra.gmra.mrb[12].mxu1 %v5002_v42  ;;  %3834 = vmatprep.subr.bf16.mxu1 %v3833_v26  ;;  %v3259_v42 = vld [vmem:[%s6009_s6 + $0x120] sm:$0xff]  ;;  %v1575_v26 = vld [vmem:[%s6009_s6 + $0x30] sm:$0xff] }
 0x28c   : > { %3243 = vmatprep.mubr.msk.f32.mxu1 %vm1378_vm9, %v1356_v44  ;;  %3836 = vmatpush1.bf16.msra.mxu1 %v3835_v29  ;;  %v3847_v43 = vpack.c.bf16 %v3259_v42, %v3257_v41  ;;  %v3859_v30 = vpack.c.bf16 %v1575_v26, %v1573_v24  ;;  %v1588_v41 = vld [vmem:[%s6009_s6 + $0x98] sm:$0xff]  ;;  %v3867_v42 = vpack.c.bf16 %v1583_v36, %v1581_v53  ;;  %v3304_v26 = vld [vmem:[%s6009_s6 + $0x228] sm:$0xff] }
 0x28d   : > { %3838 = vmatprep.subr.bf16.mxu1 %v3837_v21  ;;  %v3302_v24 = vld [vmem:[%s6009_s6 + $0x218] sm:$0xff]  ;;  %v3312_v53 = vld [vmem:[%s6009_s6 + $0x268] sm:$0xff] }
 0x28f   : > { %1551 = vmatmul.mubr.f32.gmra.mrb[14].mxu1 %v1355_v56  ;;  %v3853_v56 = vpack.c.bf16 %v1572_v61, %v1570_v55  ;;  %v3280_v55 = vld [vmem:[%s6009_s6 + $0x188] sm:$0xff]  ;;  %v3282_v61 = vld [vmem:[%s6009_s6 + $0x198] sm:$0xff] }
 0x290   : > { %1694 = vmatprep.mubr.f32.mxu1 %v4277_v7  ;;  %3840 = vmatpush1.bf16.msra.mxu1 %v3839_v32  ;;  %v1579_v32 = vld [vmem:[%s6009_s6 + $0x50] sm:$0xff] }
 0x291   : > { %3842 = vmatprep.subr.bf16.mxu1 %v3841_v33  ;;  %v1582_v33 = vld [vmem:[%s6009_s6 + $0x68] sm:$0xff]  ;;  %v3863_v35 = vpack.c.bf16 %v1579_v32, %v1577_v48  ;;  %v3893_v48 = vpack.c.bf16 %v3304_v26, %v3302_v24  ;;  %v3343_v26 = vld [vmem:[%s6009_s6 + $0x340] sm:$0xff] }
 0x294   : > { %3844 = vmatpush1.bf16.msra.mxu1 %v3843_v39  ;;  %v3865_v39 = vpack.c.bf16 %v1584_v34, %v1582_v33  ;;  %v3305_v34 = vld [vmem:[%s6009_s6 + $0x230] sm:$0xff] }
 0x295   : > { %3846 = vmatprep.subr.bf16.mxu1 %v3845_v40  ;;  %v1586_v40 = vld [vmem:[%s6009_s6 + $0x88] sm:$0xff] }
 0x298   : > { %3848 = vmatpush1.bf16.msra.mxu1 %v3847_v43  ;;  %v3869_v43 = vpack.c.bf16 %v1588_v41, %v1586_v40  ;;  %v3309_v41 = vld [vmem:[%s6009_s6 + $0x250] sm:$0xff] }
 0x299   : > { %3850 = vmatprep.subr.bf16.mxu1 %v3849_v45  ;;  %v3871_v45 = vpack.c.bf16 %v1587_v38, %v1585_v49 }
 0x29c   : > { %3852 = vmatpush1.bf16.msra.mxu1 %v3851_v50  ;;  %v3278_v50 = vld [vmem:[%s6009_s6 + $0x178] sm:$0xff] }
 0x29d   : > { %3267 = vmatprep.subr.msk.mxu1 %vm1107_vm1, %v3266_v52  ;;  %v3275_v52 = vld [vmem:[%s6009_s6 + $0x160] sm:$0xff] }
 0x2a0   : > { %3268 = vmatpush1.msk.msra.mxu1 %vm1107_vm1, %v3265_v51  ;;  %v3277_v51 = vld [vmem:[%s6009_s6 + $0x170] sm:$0xff] }
 0x2a1   : > { %3854 = vmatprep.subr.bf16.mxu1 %v3853_v56  ;;  %v1589_v56 = vld [vmem:[%s6009_s6 + $0xa0] sm:$0xf] }
 0x334   : > { %v1451_v44 = vpop.f32.mrb[8].mxu1 }
 0x335   : > { %v1453_v54 = vpop.f32.mrb[9].mxu1 }
 0x336   : > { %v3875_v54 = vpack.c.bf16 %v3277_v51, %v3275_v52  ;;  %v3317_v51 = vld [vmem:[%s6009_s6 + $0x290] sm:$0xff] }
 0x338   : > { %v1456_v57 = vpop.f32.mrb[10].mxu1 }
 0x339   : > { %v1458_v58 = vpop.f32.mrb[11].mxu1 }
 0x33a   : > { %v3279_v58 = vld [vmem:[%s6009_s6 + $0x180] sm:$0xff] }
 0x35e   : > { %v1547_v59 = vpop.f32.mrb[12].mxu1 }
 0x35f   : > { %v1556_v63 = vmax.f32 %v1451_v44, %v1547_v59  ;;  %v1549_v0 = vpop.f32.mrb[13].mxu1  ;;  %v3873_v44 = vpack.c.bf16 %v3278_v50, %v3276_v47  ;;  %v3281_v59 = vld [vmem:[%s6009_s6 + $0x190] sm:$0xff]  ;;  %v3318_v47 = vld [vmem:[%s6009_s6 + $0x298] sm:$0xff] }
 0x360   : > { %v3879_v0 = vpack.c.bf16 %v3281_v59, %v3279_v58  ;;  %v3329_v58 = vld [vmem:[%s6009_s6 + $0x2d0] sm:$0xff]  ;;  %v3332_v59 = vld [vmem:[%s6009_s6 + $0x2e8] sm:$0xff] }
 0x361   : > { %v1565_v1 = vadd.f32 %v3244_v62, %v1556_v63  ;;  %v3286_v63 = vld [vmem:[%s6009_s6 + $0x1b8] sm:$0xff] }
 0x362   : > { %v1552_v2 = vpop.f32.mrb[14].mxu1 }
 0x363   : > { %v1557_v3 = vmax.f32 %v1456_v57, %v1552_v2  ;;  %v1554_v4 = vpop.f32.mrb[15].mxu1  ;;  %v5158_v5 = vmax.f32 %v1565_v1, 0.0  ;;  %v3877_v57 = vpack.c.bf16 %v3282_v61, %v3280_v55  ;;  %v3283_v2 = vld [vmem:[%s6009_s6 + $0x1a0] sm:$0xff] }
 0x364   : > { %v3288_v4 = vld [vmem:[%s6009_s6 + $0x1c8] sm:$0xff]  ;;  %v3319_v55 = vld [vmem:[%s6009_s6 + $0x2a0] sm:$0xff] }
 0x365   : > { %v1566_v9 = vadd.f32 %v3244_v62, %v1557_v3  ;;  %v1616_v14 = vrot.slane %v5158_v5, 1  ;;  %v1817_v15 = vrot.slane %v5158_v5, 2  ;;  %v1934_v16 = vrot.slane %v5158_v5, 3  ;;  %v3284_v62 = vld [vmem:[%s6009_s6 + $0x1a8] sm:$0xff]  ;;  %v3285_v3 = vld [vmem:[%s6009_s6 + $0x1b0] sm:$0xff] }
 0x366   : > { %v2051_v17 = vrot.slane %v5158_v5, 4  ;;  %v3881_v1 = vpack.c.bf16 %v3286_v63, %v3284_v62  ;;  %v3883_v6 = vpack.c.bf16 %v3285_v3, %v3283_v2  ;;  %v3911_v61 = vpack.c.bf16 %v3319_v55, %v3317_v51  ;;  %v3334_v62 = vld [vmem:[%s6009_s6 + $0x2f8] sm:$0xff]  ;;  %v3321_v63 = vld [vmem:[%s6009_s6 + $0x2b0] sm:$0xf]  ;;  %v3331_v3 = vld [vmem:[%s6009_s6 + $0x2e0] sm:$0xff] }
 0x367   : > { %v5166_v10 = vmax.f32 %v1566_v9, 0.0  ;;  %v3287_v9 = vld [vmem:[%s6009_s6 + $0x1c0] sm:$0xff]  ;;  %v3917_v2 = vpack.c.bf16 %v3334_v62, %v3332_v59  ;;  %v2269_v59 = vld [vmem:[%s6011_s8 + $0x88] sm:$0xff] }
 0x368   : > { %v2264_v55 = vld [vmem:[%s6011_s8 + $0x60] sm:$0xff] }
 0x369   : > { %v1617_v18 = vrot.slane %v5166_v10, 1  ;;  %v1818_v19 = vrot.slane %v5166_v10, 2  ;;  %v1935_v20 = vrot.slane %v5166_v10, 3  ;;  %v2052_v22 = vrot.slane %v5166_v10, 4 }
 0x36b   : > { %v1618_v27 = vsel %vm603_vm2, %v1616_v14, %v1617_v18  ;;  %v5198_v29 = vsel %vm831_vm4, %v1817_v15, %v1818_v19  ;;  %v5203_v21 = vsel %vm969_vm0, %v1934_v16, %v1935_v20  ;;  %v5208_v25 = vsel %vm1107_vm1, %v2051_v17, %v2052_v22  ;;  %v3291_v16 = vld [vmem:[%s6009_s6 + $0x1e0] sm:$0xff]  ;;  %v3293_v17 = vld [vmem:[%s6009_s6 + $0x1f0] sm:$0xff] }
 0x36c   : > { %3269 = vmatmul.mubr.msk.f32.vlgmr.msra.gmra.mrb[16].mxu1 %vm1619_vm10, %v1618_v27  ;;  %v3889_v15 = vpack.c.bf16 %v3294_v13, %v3292_v12  ;;  %v3301_v27 = vld [vmem:[%s6009_s6 + $0x210] sm:$0xff]  ;;  %v3340_v13 = vld [vmem:[%s6009_s6 + $0x328] sm:$0xff]  ;;  %vm2468_vm0 = vcmask 654336  }
 0x36d   : > { %3856 = vmatpush1.bf16.msra.mxu1 %v3855_v11  ;;  %1700 = vmatprep.mubr.f32.mxu1 %v4277_v7  ;;  %v3289_v11 = vld [vmem:[%s6009_s6 + $0x1d0] sm:$0xff]  ;;  %v3895_v32 = vpack.c.bf16 %v3303_v28, %v3301_v27 }
 0x36e   : > { %3858 = vmatprep.subr.bf16.mxu1 %v3857_v23  ;;  %v3887_v14 = vpack.c.bf16 %v3289_v11, %v3287_v9  ;;  %v3296_v23 = vld [vmem:[%s6009_s6 + $0x208] sm:$0xf]  ;;  %v3335_v11 = vld [vmem:[%s6009_s6 + $0x300] sm:$0xff]  ;;  %v3337_v12 = vld [vmem:[%s6009_s6 + $0x310] sm:$0xff] }
 0x36f   : > { %v3345_v27 = vld [vmem:[%s6009_s6 + $0x350] sm:$0xff] }
 0x370   : > { %3270 = vmatmul.mubr.msk.f32.gmra.mrb[18].mxu1 %vm1619_vm10, %v1617_v18  ;;  %v3891_v18 = vpack.c.bf16 %v3293_v17, %v3291_v16  ;;  %v3339_v16 = vld [vmem:[%s6009_s6 + $0x320] sm:$0xff]  ;;  %v3341_v17 = vld [vmem:[%s6009_s6 + $0x330] sm:$0xff]  ;;  %v3931_v28 = vpack.c.bf16 %v3345_v27, %v3343_v26  ;;  %v2351_v26 = vld [vmem:[%s6012_s9 + $0x28] sm:$0xff] }
 0x371   : > { %3860 = vmatpush1.bf16.msra.mxu1 %v3859_v30  ;;  %1781 = vmatprep.mubr.f32.mxu1 %v4277_v7  ;;  %v3308_v30 = vld [vmem:[%s6009_s6 + $0x248] sm:$0xff] }
 0x372   : > { %3862 = vmatprep.subr.bf16.mxu1 %v3861_v31  ;;  %v3295_v31 = vld [vmem:[%s6009_s6 + $0x200] sm:$0xf]  ;;  %v3897_v33 = vpack.c.bf16 %v3308_v30, %v3306_v37  ;;  %v3348_v37 = vld [vmem:[%s6009_s6 + $0x368] sm:$0xf] }
 0x373   : > { %v3347_v30 = vld [vmem:[%s6009_s6 + $0x360] sm:$0xf] }
 0x375   : > { %3864 = vmatpush1.bf16.msra.mxu1 %v3863_v35  ;;  %v3307_v35 = vld [vmem:[%s6009_s6 + $0x240] sm:$0xff] }
 0x376   : > { %3866 = vmatprep.subr.bf16.mxu1 %v3865_v39  ;;  %v3310_v39 = vld [vmem:[%s6009_s6 + $0x258] sm:$0xff]  ;;  %v3899_v36 = vpack.c.bf16 %v3307_v35, %v3305_v34 }
 0x377   : > { %v3901_v40 = vpack.c.bf16 %v3312_v53, %v3310_v39  ;;  %v2253_v39 = vld [vmem:[%s6011_s8 + $0x8] sm:$0xff]  ;;  %v2254_v53 = vld [vmem:[%s6011_s8 + $0x10] sm:$0xff] }
 0x379   : > { %3868 = vmatpush1.bf16.msra.mxu1 %v3867_v42  ;;  %v3311_v42 = vld [vmem:[%s6009_s6 + $0x260] sm:$0xff] }
 0x37a   : > { %3870 = vmatprep.subr.bf16.mxu1 %v3869_v43  ;;  %v3314_v43 = vld [vmem:[%s6009_s6 + $0x278] sm:$0xff]  ;;  %v3903_v49 = vpack.c.bf16 %v3311_v42, %v3309_v41  ;;  %v2256_v42 = vld [vmem:[%s6011_s8 + $0x20] sm:$0xff] }
 0x37d   : > { %3872 = vmatpush1.bf16.msra.mxu1 %v3871_v45  ;;  %v3313_v45 = vld [vmem:[%s6009_s6 + $0x270] sm:$0xff] }
 0x37e   : > { %3271 = vmatprep.subr.msk.mxu1 %vm1107_vm1, %v1590_v46  ;;  %v3315_v46 = vld [vmem:[%s6009_s6 + $0x280] sm:$0xff] }
 0x37f   : > { %v3907_v50 = vpack.c.bf16 %v3315_v46, %v3313_v45  ;;  %v2260_v46 = vld [vmem:[%s6011_s8 + $0x40] sm:$0xff] }
 0x381   : > { %3272 = vmatpush1.msk.msra.mxu1 %vm1107_vm1, %v1589_v56  ;;  %v3322_v56 = vld [vmem:[%s6009_s6 + $0x2b8] sm:$0xf] }
 0x382   : > { %3273 = vmatmul.mubr.msk.f32.vlgmr.msra.gmra.mrb[16].mxu1 %vm1619_vm10, %v5158_v5  ;;  %3874 = vmatprep.subr.bf16.mxu1 %v3873_v44  ;;  %v3290_v5 = vld [vmem:[%s6009_s6 + $0x1d8] sm:$0xff]  ;;  %v3328_v44 = vld [vmem:[%s6009_s6 + $0x2c8] sm:$0xff] }
 0x383   : > { %3876 = vmatpush1.bf16.msra.mxu1 %v3875_v54  ;;  %1787 = vmatprep.mubr.f32.mxu1 %v4277_v7  ;;  %v3885_v8 = vpack.c.bf16 %v3290_v5, %v3288_v4  ;;  %v3330_v54 = vld [vmem:[%s6009_s6 + $0x2d8] sm:$0xff]  ;;  %v3333_v4 = vld [vmem:[%s6009_s6 + $0x2f0] sm:$0xff]  ;;  %v3336_v5 = vld [vmem:[%s6009_s6 + $0x308] sm:$0xff] }
 0x384   : > { %3878 = vmatprep.subr.bf16.mxu1 %v3877_v57  ;;  %v3327_v57 = vld [vmem:[%s6009_s6 + $0x2c0] sm:$0xff] }
 0x386   : > { %3274 = vmatmul.mubr.msk.f32.gmra.mrb[18].mxu1 %vm1619_vm10, %v5166_v10  ;;  %v2145_v10 = vld [vmem:[%s6010_s7] sm:$0xff] }
 0x387   : > { %3880 = vmatpush1.bf16.msra.mxu1 %v3879_v0  ;;  %1894 = vmatprep.mubr.f32.mxu1 %v4277_v7  ;;  %v3913_v0 = vpack.c.bf16 %v3330_v54, %v3328_v44  ;;  %v2266_v44 = vld [vmem:[%s6011_s8 + $0x70] sm:$0xff]  ;;  %v2267_v54 = vld [vmem:[%s6011_s8 + $0x78] sm:$0xff] }
 0x388   : > { %3882 = vmatprep.subr.bf16.mxu1 %v3881_v1  ;;  %v3915_v1 = vpack.c.bf16 %v3329_v58, %v3327_v57  ;;  %v3961_v57 = vpack.c.bf16 %v2267_v54, %v2266_v44  ;;  %v2268_v58 = vld [vmem:[%s6011_s8 + $0x80] sm:$0xff] }
 0x389   : > { %v3964_v62 = vpack.c.bf16 %v2269_v59, %v2268_v58  ;;  %v2450_v54 = vld [vmem:[%s6014_s11 + $0x20] sm:$0xff]  ;;  %v2460_v58 = vld [vmem:[%s6014_s11 + $0x70] sm:$0xff]  ;;  %v2461_v59 = vld [vmem:[%s6014_s11 + $0x78] sm:$0xff] }
 0x38b   : > { %3884 = vmatpush1.bf16.msra.mxu1 %v3883_v6  ;;  %v3338_v6 = vld [vmem:[%s6009_s6 + $0x318] sm:$0xff] }
 0x38c   : > { %3886 = vmatprep.subr.bf16.mxu1 %v3885_v8  ;;  %v3919_v8 = vpack.c.bf16 %v3333_v4, %v3331_v3  ;;  %v3921_v9 = vpack.c.bf16 %v3338_v6, %v3336_v5 }
 0x38f   : > { %3888 = vmatpush1.bf16.msra.mxu1 %v3887_v14  ;;  %v3923_v14 = vpack.c.bf16 %v3337_v12, %v3335_v11  ;;  %v2346_v12 = vld [vmem:[%s6012_s9] sm:$0xff] }
 0x390   : > { %3890 = vmatprep.subr.bf16.mxu1 %v3889_v15 }
 0x393   : > { %3892 = vmatpush1.bf16.msra.mxu1 %v3891_v18  ;;  %v3344_v18 = vld [vmem:[%s6009_s6 + $0x348] sm:$0xff] }
 0x394   : > { %3297 = vmatprep.subr.msk.mxu1 %vm1107_vm1, %v3296_v23  ;;  %v3927_v23 = vpack.c.bf16 %v3341_v17, %v3339_v16 }
 0x397   : > { %3298 = vmatpush1.msk.msra.mxu1 %vm1107_vm1, %v3295_v31 }
 0x398   : > { %3299 = vmatmul.mubr.msk.f32.vlgmr.msra.gmra.mrb[16].mxu1 %vm1619_vm10, %v5198_v29  ;;  %3894 = vmatprep.subr.bf16.mxu1 %v3893_v48  ;;  %v3316_v29 = vld [vmem:[%s6009_s6 + $0x288] sm:$0xff] }
 0x399   : > { %3896 = vmatpush1.bf16.msra.mxu1 %v3895_v32  ;;  %1900 = vmatprep.mubr.f32.mxu1 %v4277_v7  ;;  %v3905_v38 = vpack.c.bf16 %v3316_v29, %v3314_v43  ;;  %v2257_v43 = vld [vmem:[%s6011_s8 + $0x28] sm:$0xff] }
 0x39a   : > { %3898 = vmatprep.subr.bf16.mxu1 %v3897_v33  ;;  %v3946_v29 = vpack.c.bf16 %v2257_v43, %v2256_v42  ;;  %v2364_v43 = vld [vmem:[%s6012_s9 + $0x90] sm:$0xff] }
 0x39c   : > { %3300 = vmatmul.mubr.msk.f32.gmra.mrb[18].mxu1 %vm1619_vm10, %v1818_v19  ;;  %v3320_v19 = vld [vmem:[%s6009_s6 + $0x2a8] sm:$0xff] }
 0x39d   : > { %3900 = vmatpush1.bf16.msra.mxu1 %v3899_v36  ;;  %2011 = vmatprep.mubr.f32.mxu1 %v4277_v7  ;;  %v3909_v52 = vpack.c.bf16 %v3320_v19, %v3318_v47  ;;  %v2255_v36 = vld [vmem:[%s6011_s8 + $0x18] sm:$0xff]  ;;  %v2261_v47 = vld [vmem:[%s6011_s8 + $0x48] sm:$0xff] }
 0x39e   : > { %3902 = vmatprep.subr.bf16.mxu1 %v3901_v40  ;;  %v2146_v40 = vld [vmem:[%s6010_s7 + $0x8] sm:$0x3]  ;;  %v3943_v41 = vpack.c.bf16 %v2255_v36, %v2254_v53  ;;  %v3952_v19 = vpack.c.bf16 %v2261_v47, %v2260_v46  ;;  %v2361_v53 = vld [vmem:[%s6012_s9 + $0x78] sm:$0xff]  ;;  %v2456_v46 = vld [vmem:[%s6014_s11 + $0x50] sm:$0xff] }
 0x3a1   : > { %3904 = vmatpush1.bf16.msra.mxu1 %v3903_v49  ;;  %v2258_v49 = vld [vmem:[%s6011_s8 + $0x30] sm:$0xff] }
 0x3a2   : > { %3906 = vmatprep.subr.bf16.mxu1 %v3905_v38  ;;  %v2259_v38 = vld [vmem:[%s6011_s8 + $0x38] sm:$0xff] }
 0x3a3   : > { %v3949_v45 = vpack.c.bf16 %v2259_v38, %v2258_v49  ;;  %v2446_v38 = vld [vmem:[%s6014_s11] sm:$0xff] }
 0x3a5   : > { %3908 = vmatpush1.bf16.msra.mxu1 %v3907_v50  ;;  %v2262_v50 = vld [vmem:[%s6011_s8 + $0x50] sm:$0xff] }
 0x3a6   : > { %3910 = vmatprep.subr.bf16.mxu1 %v3909_v52  ;;  %v2263_v52 = vld [vmem:[%s6011_s8 + $0x58] sm:$0xff] }
 0x3a7   : > { %v3955_v51 = vpack.c.bf16 %v2263_v52, %v2262_v50  ;;  %v2448_v50 = vld [vmem:[%s6014_s11 + $0x10] sm:$0xff]  ;;  %v2449_v52 = vld [vmem:[%s6014_s11 + $0x18] sm:$0xff] }
 0x3a9   : > { %3912 = vmatpush1.bf16.msra.mxu1 %v3911_v61  ;;  %v2265_v61 = vld [vmem:[%s6011_s8 + $0x68] sm:$0xff] }
 0x3aa   : > { %3323 = vmatprep.subr.msk.mxu1 %vm1107_vm1, %v3322_v56  ;;  %v3958_v56 = vpack.c.bf16 %v2265_v61, %v2264_v55  ;;  %v2458_v55 = vld [vmem:[%s6014_s11 + $0x60] sm:$0xff]  ;;  %v2459_v61 = vld [vmem:[%s6014_s11 + $0x68] sm:$0xff] }
 0x3ab   : > { %v4003_v44 = vpack.c.bf16 %v2459_v61, %v2458_v55  ;;  %v2782_v55 = vld [vmem:[%s6014_s11 + $0x148] sm:$0xff] }
 0x3ad   : > { %3324 = vmatpush1.msk.msra.mxu1 %vm1107_vm1, %v3321_v63  ;;  %v2270_v63 = vld [vmem:[%s6011_s8 + $0x90] sm:$0xff] }
 0x3ae   : > { %3325 = vmatmul.mubr.msk.f32.vlgmr.msra.gmra.mrb[16].mxu1 %vm1619_vm10, %v5203_v21  ;;  %3914 = vmatprep.subr.bf16.mxu1 %v3913_v0  ;;  %v3342_v21 = vld [vmem:[%s6009_s6 + $0x338] sm:$0xff] }
 0x3af   : > { %3916 = vmatpush1.bf16.msra.mxu1 %v3915_v1  ;;  %2017 = vmatprep.mubr.f32.mxu1 %v4277_v7  ;;  %v3925_v15 = vpack.c.bf16 %v3342_v21, %v3340_v13  ;;  %v2271_v0 = vld [vmem:[%s6011_s8 + $0x98] sm:$0xff]  ;;  %v2347_v13 = vld [vmem:[%s6012_s9 + $0x8] sm:$0xff] }
 0x3b0   : > { %3918 = vmatprep.subr.bf16.mxu1 %v3917_v2  ;;  %v3967_v1 = vpack.c.bf16 %v2271_v0, %v2270_v63  ;;  %v3970_v17 = vpack.c.bf16 %v2347_v13, %v2346_v12  ;;  %v4006_v63 = vpack.c.bf16 %v2461_v59, %v2460_v58  ;;  %v2452_v0 = vld [vmem:[%s6014_s11 + $0x30] sm:$0xff]  ;;  %v2465_v12 = vld [vmem:[%s6014_s11 + $0x98] sm:$0xff]  ;;  %v2785_v59 = vld [vmem:[%s6014_s11 + $0x160] sm:$0xff] }
 0x3b2   : > { %3326 = vmatmul.mubr.msk.f32.gmra.mrb[18].mxu1 %vm1619_vm10, %v1935_v20  ;;  %v3346_v20 = vld [vmem:[%s6009_s6 + $0x358] sm:$0xff] }
 0x3b3   : > { %3920 = vmatpush1.bf16.msra.mxu1 %v3919_v8  ;;  %2128 = vmatprep.mubr.f32.mxu1 %v4277_v7  ;;  %v3929_v24 = vpack.c.bf16 %v3346_v20, %v3344_v18  ;;  %v2348_v18 = vld [vmem:[%s6012_s9 + $0x10] sm:$0xff]  ;;  %v2349_v20 = vld [vmem:[%s6012_s9 + $0x18] sm:$0xff] }
 0x3b4   : > { %3922 = vmatprep.subr.bf16.mxu1 %v3921_v9 }
 0x3b7   : > { %3924 = vmatpush1.bf16.msra.mxu1 %v3923_v14 }
 0x3b8   : > { %3926 = vmatprep.subr.bf16.mxu1 %v3925_v15 }
 0x3bb   : > { %3928 = vmatpush1.bf16.msra.mxu1 %v3927_v23  ;;  %v3973_v23 = vpack.c.bf16 %v2349_v20, %v2348_v18  ;;  %v2697_v20 = vld [vmem:[%s6014_s11 + $0xf0] sm:$0xff] }
 0x3bc   : > { %3930 = vmatprep.subr.bf16.mxu1 %v3929_v24  ;;  %v2350_v24 = vld [vmem:[%s6012_s9 + $0x20] sm:$0xff] }
 0x3bd   : > { %v3976_v27 = vpack.c.bf16 %v2351_v26, %v2350_v24  ;;  %v2613_v26 = vld [vmem:[%s6014_s11 + $0xa0] sm:$0xff] }
 0x3bf   : > { %3932 = vmatpush1.bf16.msra.mxu1 %v3931_v28  ;;  %v2352_v28 = vld [vmem:[%s6012_s9 + $0x30] sm:$0xff] }
 0x3c0   : > { %3349 = vmatprep.subr.msk.mxu1 %vm1107_vm1, %v3348_v37  ;;  %v2353_v37 = vld [vmem:[%s6012_s9 + $0x38] sm:$0xff] }
 0x3c3   : > { %3350 = vmatpush1.msk.msra.mxu1 %vm1107_vm1, %v3347_v30  ;;  %v3979_v30 = vpack.c.bf16 %v2353_v37, %v2352_v28 }
 0x3c4   : > { %3351 = vmatmul.mubr.msk.f32.vlgmr.msra.gmra.mrb[16].mxu1 %vm1619_vm10, %v5208_v25  ;;  %3999 = vmatprep.subr.bf16.mxu1 %v4279_v60  ;;  %v2252_v25 = vld [vmem:[%s6011_s8] sm:$0xff] }
 0x3c5   : > { %2134 = vmatprep.mubr.f32.mxu1 %v4277_v7 }
 0x3c8   : > { %3352 = vmatmul.mubr.msk.f32.gmra.mrb[18].mxu1 %vm1619_vm10, %v2052_v22  ;;  %v3940_v22 = vpack.c.bf16 %v2253_v39, %v2252_v25  ;;  %v2358_v25 = vld [vmem:[%s6012_s9 + $0x60] sm:$0xff]  ;;  %v2359_v39 = vld [vmem:[%s6012_s9 + $0x68] sm:$0xff] }
 0x3c9   : > { %3478 = vmatprep.mubr.msk.f32.mxu1 %vm4280_vm15, %v4277_v7 }
 0x497   : > { %v2130_v31 = vpop.f32.mrb[16].mxu1 }
 0x498   : > { %v2132_v48 = vpop.f32.mrb[17].mxu1 }
 0x49b   : > { %v2136_v32 = vpop.f32.mrb[18].mxu1 }
 0x49c   : > { %v3936_v33 = vpack.c.bf16 %v2136_v32, %v2130_v31  ;;  %v2138_v34 = vpop.f32.mrb[19].mxu1  ;;  %v2354_v31 = vld [vmem:[%s6012_s9 + $0x40] sm:$0xff] }
 0x49d   : > { %v3933_v35 = vpack.c.bf16 %v2138_v34, %v2132_v48  ;;  %v2355_v48 = vld [vmem:[%s6012_s9 + $0x48] sm:$0xff]  ;;  %v2357_v34 = vld [vmem:[%s6012_s9 + $0x58] sm:$0xff] }
 0x49e   : > { %v3982_v32 = vpack.c.bf16 %v2355_v48, %v2354_v31  ;;  %v2700_v31 = vld [vmem:[%s6014_s11 + $0x108] sm:$0xff] }
 0x49f   : > { %3935 = vmatprep.subr.msk.bf16.mxu0 %vm3934_vm11, %v3933_v35 }
 0x4a0   : > { %3938 = vmatpush1.bf16.msk.msra.mxu0 %vm3934_vm11, %v3936_v33  ;;  %v2356_v33 = vld [vmem:[%s6012_s9 + $0x50] sm:$0xff] }
 0x4a1   : > { %3939 = vmatprep.subr.bf16.mxu0 %v4279_v60  ;;  %v3985_v35 = vpack.c.bf16 %v2357_v34, %v2356_v33  ;;  %v2615_v33 = vld [vmem:[%s6014_s11 + $0xb0] sm:$0xff]  ;;  %v2616_v34 = vld [vmem:[%s6014_s11 + $0xb8] sm:$0xff] }
 0x4a3   : > { %3355 = vmatmul.mubr.msk.f32.vlgmr.msra.gmra.mrb[8].mxu0 %vm2147_vm12, %v2145_v10  ;;  %v3988_v10 = vpack.c.bf16 %v2359_v39, %v2358_v25  ;;  %v2701_v25 = vld [vmem:[%s6014_s11 + $0x110] sm:$0xff]  ;;  %v2702_v39 = vld [vmem:[%s6014_s11 + $0x118] sm:$0xff] }
 0x4a4   : > { %2230 = vmatprep.mubr.f32.mxu0 %v4277_v7  ;;  %3941 = vmatpush1.bf16.msra.mxu0 %v3940_v22  ;;  %v2360_v22 = vld [vmem:[%s6012_s9 + $0x70] sm:$0xff] }
 0x4a5   : > { %3942 = vmatprep.subr.bf16.mxu0 %v4279_v60  ;;  %v3991_v36 = vpack.c.bf16 %v2361_v53, %v2360_v22  ;;  %v2617_v22 = vld [vmem:[%s6014_s11 + $0xc0] sm:$0xff]  ;;  %v2618_v53 = vld [vmem:[%s6014_s11 + $0xc8] sm:$0xff] }
 0x4a7   : > { %3356 = vmatmul.mubr.msk.f32.gmra.mrb[10].mxu0 %vm2147_vm12, %v2146_v40  ;;  %v2362_v40 = vld [vmem:[%s6012_s9 + $0x80] sm:$0xff] }
 0x4a8   : > { %3944 = vmatpush1.bf16.msra.mxu0 %v3943_v41  ;;  %v2363_v41 = vld [vmem:[%s6012_s9 + $0x88] sm:$0xff] }
 0x4a9   : > { %3945 = vmatprep.subr.bf16.mxu0 %v4279_v60  ;;  %v3994_v42 = vpack.c.bf16 %v2363_v41, %v2362_v40  ;;  %v2703_v40 = vld [vmem:[%s6014_s11 + $0x120] sm:$0xff]  ;;  %v2704_v41 = vld [vmem:[%s6014_s11 + $0x128] sm:$0xff] }
 0x4ac   : > { %3947 = vmatpush1.bf16.msra.mxu0 %v3946_v29  ;;  %v2365_v29 = vld [vmem:[%s6012_s9 + $0x98] sm:$0xff] }
 0x4ad   : > { %3948 = vmatprep.subr.bf16.mxu0 %v4279_v60  ;;  %v3997_v49 = vpack.c.bf16 %v2365_v29, %v2364_v43  ;;  %v2619_v43 = vld [vmem:[%s6014_s11 + $0xd0] sm:$0xff]  ;;  %v2620_v29 = vld [vmem:[%s6014_s11 + $0xd8] sm:$0xff] }
 0x4b0   : > { %3950 = vmatpush1.bf16.msra.mxu0 %v3949_v45  ;;  %v2447_v45 = vld [vmem:[%s6014_s11 + $0x8] sm:$0xff] }
 0x4b1   : > { %3951 = vmatprep.subr.bf16.mxu0 %v4279_v60  ;;  %v4015_v47 = vpack.c.bf16 %v2447_v45, %v2446_v38  ;;  %v2705_v38 = vld [vmem:[%s6014_s11 + $0x130] sm:$0xff]  ;;  %v2706_v45 = vld [vmem:[%s6014_s11 + $0x138] sm:$0xff] }
 0x4b4   : > { %3953 = vmatpush1.bf16.msra.mxu0 %v3952_v19  ;;  %v2457_v19 = vld [vmem:[%s6014_s11 + $0x58] sm:$0xff] }
 0x4b5   : > { %3954 = vmatprep.subr.bf16.mxu0 %v4279_v60 }
 0x4b8   : > { %3956 = vmatpush1.bf16.msra.mxu0 %v3955_v51  ;;  %v4000_v51 = vpack.c.bf16 %v2457_v19, %v2456_v46  ;;  %v4039_v46 = vpack.c.bf16 %v2620_v29, %v2619_v43  ;;  %v2622_v19 = vld [vmem:[%s6014_s11 + $0xe8] sm:$0xff]  ;;  %v2964_v29 = vld [vmem:[%s6018_s15 + $0x40] sm:$0xff] }
 0x4b9   : > { %3957 = vmatprep.subr.bf16.mxu0 %v4279_v60 }
 0x4ba   : > { %4001 = vmatpush3.bf16.msra.mxu1 %v4000_v51  ;;  %v2781_v51 = vld [vmem:[%s6014_s11 + $0x140] sm:$0xff] }
 0x4bb   : > { %4002 = vmatprep.subr.bf16.mxu1 %v4279_v60 }
 0x4bc   : > { %3959 = vmatpush1.bf16.msra.mxu0 %v3958_v56  ;;  %v4018_v56 = vpack.c.bf16 %v2449_v52, %v2448_v50  ;;  %v4057_v50 = vpack.c.bf16 %v2706_v45, %v2705_v38  ;;  %v2966_v45 = vld [vmem:[%s6018_s15 + $0x50] sm:$0xff] }
 0x4bd   : > { %3960 = vmatprep.subr.bf16.mxu0 %v4279_v60 }
 0x4be   : > { %4004 = vmatpush3.bf16.msra.mxu1 %v4003_v44 }
 0x4bf   : > { %4005 = vmatprep.subr.bf16.mxu1 %v4279_v60 }
 0x4c0   : > { %3962 = vmatpush1.bf16.msra.mxu0 %v3961_v57  ;;  %v2451_v57 = vld [vmem:[%s6014_s11 + $0x28] sm:$0xff] }
 0x4c1   : > { %3963 = vmatprep.subr.bf16.mxu0 %v4279_v60 }
 0x4c2   : > { %4007 = vmatpush3.bf16.msra.mxu1 %v4006_v63 }
 0x4c3   : > { %4008 = vmatprep.subr.bf16.mxu1 %v4279_v60 }
 0x4c4   : > { %3965 = vmatpush1.bf16.msra.mxu0 %v3964_v62  ;;  %v4021_v62 = vpack.c.bf16 %v2451_v57, %v2450_v54  ;;  %v2783_v54 = vld [vmem:[%s6014_s11 + $0x150] sm:$0xff]  ;;  %v2784_v57 = vld [vmem:[%s6014_s11 + $0x158] sm:$0xff] }
 0x4c5   : > { %3966 = vmatprep.subr.bf16.mxu0 %v4279_v60  ;;  %v4063_v58 = vpack.c.bf16 %v2784_v57, %v2783_v54 }
 0x4c8   : > { %3968 = vmatpush1.bf16.msra.mxu0 %v3967_v1  ;;  %v2453_v1 = vld [vmem:[%s6014_s11 + $0x38] sm:$0xff] }
 0x4c9   : > { %3969 = vmatprep.subr.bf16.mxu0 %v4279_v60 }
 0x576   : > { %v2226_v2 = vpop.f32.mrb[8].mxu0 }
 0x577   : > { %v2228_v3 = vpop.f32.mrb[9].mxu0  ;;  %v2242_v5 = vrot.slane %v2226_v2, 5 }
 0x578   : > { %v2245_v9 = vrot.slane %v2228_v3, 5 }
 0x57a   : > { %v2232_v4 = vpop.f32.mrb[10].mxu0 }
 0x57b   : > { %v2243_v6 = vrot.slane %v2232_v4, 5  ;;  %v2234_v8 = vpop.f32.mrb[11].mxu0  ;;  %v2463_v4 = vld [vmem:[%s6014_s11 + $0x88] sm:$0xff] }
 0x57c   : > { %v2246_v11 = vrot.slane %v2234_v8, 5  ;;  %v2455_v8 = vld [vmem:[%s6014_s11 + $0x48] sm:$0xff] }
 0x57d   : > { %v2244_v21 = vsel %vm2241_vm13, %v2242_v5, %v2243_v6  ;;  %v2454_v6 = vld [vmem:[%s6014_s11 + $0x40] sm:$0xff] }
 0x57e   : > { %v2250_v14 = vmax.f32 %v2226_v2, %v2244_v21  ;;  %v2247_v15 = vsel %vm2241_vm13, %v2245_v9, %v2246_v11  ;;  %v4024_v2 = vpack.c.bf16 %v2453_v1, %v2452_v0  ;;  %v4027_v9 = vpack.c.bf16 %v2455_v8, %v2454_v6  ;;  %v2464_v11 = vld [vmem:[%s6014_s11 + $0x90] sm:$0xff]  ;;  %v2788_v1 = vld [vmem:[%s6014_s11 + $0x178] sm:$0xff]  ;;  %v2868_v8 = vld [vmem:[%s6016_s13] sm:$0xff] }
 0x57f   : > { %v2251_v16 = vmax.f32 %v2228_v3, %v2247_v15  ;;  %v2462_v3 = vld [vmem:[%s6014_s11 + $0x80] sm:$0xff]  ;;  %v4012_v13 = vpack.c.bf16 %v2465_v12, %v2464_v11  ;;  %v2787_v0 = vld [vmem:[%s6014_s11 + $0x170] sm:$0xff] }
 0x580   : > { %v4009_v5 = vpack.c.bf16 %v2463_v4, %v2462_v3  ;;  %v2789_v3 = vld [vmem:[%s6014_s11 + $0x180] sm:$0xff]  ;;  %v2790_v4 = vld [vmem:[%s6014_s11 + $0x188] sm:$0xff]  ;;  %v2870_v12 = vld [vmem:[%s6016_s13 + $0x10] sm:$0xff] }
 0x581   : > { %3357 = vmatprep.mubr.msk.f32.mxu0 %vm2272_vm14, %v2251_v16 }
 0x582   : > { %2341 = vmatmul.mubr.f32.vlgmr.msra.gmra.mrb[12].mxu0 %v2250_v14  ;;  %4010 = vmatpush3.bf16.msra.mxu1 %v4009_v5  ;;  %v4072_v5 = vpack.c.bf16 %v2790_v4, %v2789_v3 }
 0x583   : > { %3971 = vmatpush1.bf16.msra.mxu0 %v3970_v17  ;;  %3358 = vmatprep.mubr.msk.f32.mxu0 %vm2272_vm14, %v2251_v16  ;;  %v3359_v16 = vld [vmem:[%s6013_s10] ss:$0 sm:$0xff] }
 0x584   : > { %3972 = vmatprep.subr.bf16.mxu0 %v4279_v60  ;;  %4011 = vmatprep.subr.bf16.mxu1 %v4279_v60 }
 0x586   : > { %4013 = vmatpush3.bf16.msra.mxu1 %v4012_v13 }
 0x587   : > { %3974 = vmatpush1.bf16.msra.mxu0 %v3973_v23  ;;  %4029 = vmatprep.subr.bf16.mxu1 %v4279_v60  ;;  %v2698_v23 = vld [vmem:[%s6014_s11 + $0xf8] sm:$0xff] }
 0x588   : > { %3975 = vmatprep.subr.bf16.mxu0 %v4279_v60  ;;  %v4045_v28 = vpack.c.bf16 %v2698_v23, %v2697_v20  ;;  %v2876_v20 = vld [vmem:[%s6016_s13 + $0x40] sm:$0xff]  ;;  %v2877_v23 = vld [vmem:[%s6016_s13 + $0x48] sm:$0xff] }
 0x58b   : > { %3977 = vmatpush1.bf16.msra.mxu0 %v3976_v27  ;;  %v2614_v27 = vld [vmem:[%s6014_s11 + $0xa8] sm:$0xff] }
 0x58c   : > { %3978 = vmatprep.subr.bf16.mxu0 %v4279_v60  ;;  %v4030_v48 = vpack.c.bf16 %v2614_v27, %v2613_v26  ;;  %v2878_v26 = vld [vmem:[%s6016_s13 + $0x50] sm:$0xff]  ;;  %v2879_v27 = vld [vmem:[%s6016_s13 + $0x58] sm:$0xff] }
 0x58f   : > { %3980 = vmatpush1.bf16.msra.mxu0 %v3979_v30  ;;  %v2699_v30 = vld [vmem:[%s6014_s11 + $0x100] sm:$0xff] }
 0x590   : > { %3981 = vmatprep.subr.bf16.mxu0 %v4279_v60 }
 0x593   : > { %3983 = vmatpush1.bf16.msra.mxu0 %v3982_v32 }
 0x594   : > { %3984 = vmatprep.subr.bf16.mxu0 %v4279_v60 }
 0x597   : > { %3986 = vmatpush1.bf16.msra.mxu0 %v3985_v35  ;;  %v4048_v35 = vpack.c.bf16 %v2700_v31, %v2699_v30  ;;  %v2881_v30 = vld [vmem:[%s6016_s13 + $0x68] sm:$0xff] }
 0x598   : > { %3987 = vmatprep.subr.bf16.mxu0 %v4279_v60 }
 0x59b   : > { %3989 = vmatpush1.bf16.msra.mxu0 %v3988_v10  ;;  %v4033_v10 = vpack.c.bf16 %v2616_v34, %v2615_v33  ;;  %v2956_v34 = vld [vmem:[%s6018_s15] sm:$0xff] }
 0x59c   : > { %3990 = vmatprep.subr.bf16.mxu0 %v4279_v60 }
 0x59f   : > { %3992 = vmatpush1.bf16.msra.mxu0 %v3991_v36  ;;  %v4051_v36 = vpack.c.bf16 %v2702_v39, %v2701_v25  ;;  %v2958_v25 = vld [vmem:[%s6018_s15 + $0x10] sm:$0xff] }
 0x5a0   : > { %3993 = vmatprep.subr.bf16.mxu0 %v4279_v60 }
 0x5a3   : > { %3995 = vmatpush1.bf16.msra.mxu0 %v3994_v42  ;;  %v4036_v42 = vpack.c.bf16 %v2618_v53, %v2617_v22  ;;  %v2960_v53 = vld [vmem:[%s6018_s15 + $0x20] sm:$0xff] }
 0x5a4   : > { %3996 = vmatprep.subr.bf16.mxu0 %v4279_v60 }
 0x5a7   : > { %3998 = vmatpush1.bf16.msra.mxu0 %v3997_v49  ;;  %v4054_v49 = vpack.c.bf16 %v2704_v41, %v2703_v40  ;;  %v2962_v41 = vld [vmem:[%s6018_s15 + $0x30] sm:$0xff] }
 0x5a8   : > { %4014 = vmatprep.subr.bf16.mxu0 %v4279_v60 }
 0x5aa   : > { %2431 = vmatmul.mubr.f32.vlgmr.msra.gmra.mrb[14].mxu0 %v2250_v14 }
 0x5ab   : > { %4016 = vmatpush3.bf16.msra.mxu0 %v4015_v47  ;;  %3501 = vmatprep.mubr.msk.f32.mxu0 %vm4280_vm15, %v4277_v7  ;;  %v2621_v47 = vld [vmem:[%s6014_s11 + $0xe0] sm:$0xff] }
 0x5ac   : > { %4017 = vmatprep.subr.bf16.mxu0 %v4279_v60  ;;  %v4042_v52 = vpack.c.bf16 %v2622_v19, %v2621_v47  ;;  %v2968_v19 = vld [vmem:[%s6018_s15 + $0x60] sm:$0xff] }
 0x5af   : > { %4019 = vmatpush3.bf16.msra.mxu0 %v4018_v56  ;;  %v4060_v56 = vpack.c.bf16 %v2782_v55, %v2781_v51 }
 0x5b0   : > { %4020 = vmatprep.subr.bf16.mxu0 %v4279_v60 }
 0x5b3   : > { %4022 = vmatpush3.bf16.msra.mxu0 %v4021_v62  ;;  %v2786_v62 = vld [vmem:[%s6014_s11 + $0x168] sm:$0xff] }
 0x5b4   : > { %4023 = vmatprep.subr.bf16.mxu0 %v4279_v60  ;;  %v4066_v63 = vpack.c.bf16 %v2786_v62, %v2785_v59 }
 0x5b7   : > { %4025 = vmatpush3.bf16.msra.mxu0 %v4024_v2  ;;  %v4069_v2 = vpack.c.bf16 %v2788_v1, %v2787_v0  ;;  %v2865_v1 = vld [vmem:[%s6015_s12] sm:$0x1] }
 0x5b8   : > { %4026 = vmatprep.subr.bf16.mxu0 %v4279_v60 }
 0x5bb   : > { %4028 = vmatpush3.bf16.msra.mxu0 %v4027_v9  ;;  %v2869_v9 = vld [vmem:[%s6016_s13 + $0x8] sm:$0xff] }
 0x5bc   : > { %4044 = vmatprep.subr.bf16.mxu0 %v4279_v60  ;;  %v4075_v11 = vpack.c.bf16 %v2869_v9, %v2868_v8  ;;  %v2884_v9 = vld [vmem:[%s6017_s14] sm:$0x1] }
 0x655   : > { %v2342_v21 = vpop.f32.mrb[12].mxu0 }
 0x656   : > { %v2344_v14 = vpop.f32.mrb[13].mxu0 }
 0x657   : > { %v2873_v14 = vld [vmem:[%s6016_s13 + $0x28] sm:$0xff] }
 0x67d   : > { %v2432_v15 = vpop.f32.mrb[14].mxu0 }
 0x67e   : > { %v2436_v17 = vmax.f32 %v2342_v21, %v2432_v15  ;;  %v2434_v18 = vpop.f32.mrb[15].mxu0  ;;  %v2872_v21 = vld [vmem:[%s6016_s13 + $0x20] sm:$0xff]  ;;  %v2874_v15 = vld [vmem:[%s6016_s13 + $0x30] sm:$0xff] }
 0x680   : > { %v2444_v24 = vadd.f32 %v3359_v16, %v2436_v17  ;;  %v4081_v16 = vpack.c.bf16 %v2873_v14, %v2872_v21  ;;  %v2875_v17 = vld [vmem:[%s6016_s13 + $0x38] sm:$0xff]  ;;  %v2972_v21 = vld [vmem:[%s6043_s16] sm:$0x1] }
 0x681   : > { %v4084_v18 = vpack.c.bf16 %v2875_v17, %v2874_v15 }
 0x682   : > { %v5722_v37 = vmax.f32 %v2444_v24, 0.0  ;;  %v4087_v24 = vpack.c.bf16 %v2877_v23, %v2876_v20 }
 0x684   : > { %v2467_v32 = vrot.slane %v5722_v37, 1  ;;  %3502 = vmatmul.mubr.msk.f32.vlgmr.msra.gmra.mrb[16].mxu0 %vm2468_vm0, %v5722_v37  ;;  %v2707_v61 = vrot.slane %v5722_v37, 3  ;;  %v2623_v44 = vrot.slane %v5722_v37, 2  ;;  %v2791_v6 = vrot.slane %v5722_v37, 4  ;;  %v2880_v37 = vld [vmem:[%s6016_s13 + $0x60] sm:$0xff] }
 0x685   : > { %4046 = vmatpush3.bf16.msra.mxu0 %v4045_v28  ;;  %3547 = vmatprep.mubr.msk.f32.mxu0 %vm4280_vm15, %v4277_v7  ;;  %v4090_v28 = vpack.c.bf16 %v2879_v27, %v2878_v26  ;;  %v4093_v31 = vpack.c.bf16 %v2881_v30, %v2880_v37 }
 0x686   : > { %3479 = vmatmul.mubr.msk.f32.vlgmr.msra.gmra.mrb[20].mxu1 %vm2468_vm0, %v2467_v32  ;;  %4047 = vmatprep.subr.bf16.mxu0 %v4279_v60  ;;  %v2883_v32 = vld [vmem:[%s6016_s13 + $0x78] sm:$0xff] }
 0x687   : > { %4031 = vmatpush3.bf16.msra.mxu1 %v4030_v48  ;;  %3524 = vmatprep.mubr.msk.f32.mxu1 %vm4280_vm15, %v4277_v7  ;;  %v2882_v48 = vld [vmem:[%s6016_s13 + $0x70] sm:$0xff] }
 0x688   : > { %4032 = vmatprep.subr.bf16.mxu1 %v4279_v60  ;;  %v4096_v33 = vpack.c.bf16 %v2883_v32, %v2882_v48 }
 0x689   : > { %4049 = vmatpush3.bf16.msra.mxu0 %v4048_v35  ;;  %v2957_v35 = vld [vmem:[%s6018_s15 + $0x8] sm:$0xff] }
 0x68a   : > { %4050 = vmatprep.subr.bf16.mxu0 %v4279_v60  ;;  %v4099_v39 = vpack.c.bf16 %v2957_v35, %v2956_v34 }
 0x68b   : > { %4034 = vmatpush3.bf16.msra.mxu1 %v4033_v10  ;;  %v2959_v10 = vld [vmem:[%s6018_s15 + $0x18] sm:$0xff] }
 0x68c   : > { %4035 = vmatprep.subr.bf16.mxu1 %v4279_v60  ;;  %v4102_v22 = vpack.c.bf16 %v2959_v10, %v2958_v25 }
 0x68d   : > { %4052 = vmatpush3.bf16.msra.mxu0 %v4051_v36  ;;  %v2961_v36 = vld [vmem:[%s6018_s15 + $0x28] sm:$0xff] }
 0x68e   : > { %4053 = vmatprep.subr.bf16.mxu0 %v4279_v60  ;;  %v4105_v40 = vpack.c.bf16 %v2961_v36, %v2960_v53 }
 0x68f   : > { %4037 = vmatpush3.bf16.msra.mxu1 %v4036_v42  ;;  %v2963_v42 = vld [vmem:[%s6018_s15 + $0x38] sm:$0xff] }
 0x690   : > { %4038 = vmatprep.subr.bf16.mxu1 %v4279_v60  ;;  %v4108_v43 = vpack.c.bf16 %v2963_v42, %v2962_v41 }
 0x691   : > { %4055 = vmatpush3.bf16.msra.mxu0 %v4054_v49  ;;  %v2965_v49 = vld [vmem:[%s6018_s15 + $0x48] sm:$0xff] }
 0x692   : > { %4056 = vmatprep.subr.bf16.mxu0 %v4279_v60  ;;  %v4111_v38 = vpack.c.bf16 %v2965_v49, %v2964_v29 }
 0x693   : > { %4040 = vmatpush3.bf16.msra.mxu1 %v4039_v46  ;;  %v2967_v46 = vld [vmem:[%s6018_s15 + $0x58] sm:$0xff] }
 0x694   : > { %4041 = vmatprep.subr.bf16.mxu1 %v4279_v60  ;;  %v4114_v47 = vpack.c.bf16 %v2967_v46, %v2966_v45 }
 0x695   : > { %4058 = vmatpush3.bf16.msra.mxu0 %v4057_v50  ;;  %v2969_v50 = vld [vmem:[%s6018_s15 + $0x68] sm:$0xff] }
 0x696   : > { %4074 = vmatprep.subr.bf16.mxu0 %v4279_v60 }
 0x697   : > { %4043 = vmatpush3.bf16.msra.mxu1 %v4042_v52  ;;  %v4117_v52 = vpack.c.bf16 %v2969_v50, %v2968_v19 }
 0x698   : > { %3548 = vmatmul.mubr.msk.f32.vlgmr.msra.gmra.mrb[18].mxu0 %vm2468_vm0, %v2707_v61  ;;  %4059 = vmatprep.subr.bf16.mxu1 %v4279_v60 }
 0x699   : > { %3605 = vmatprep.mubr.msk.f32.mxu0 %vm4280_vm15, %v4277_v7  ;;  %4076 = vmatpush3.bf16.msra.mxu0 %v4075_v11 }
 0x69a   : > { %3525 = vmatmul.mubr.msk.f32.vlgmr.msra.gmra.mrb[22].mxu1 %vm2468_vm0, %v2623_v44  ;;  %4077 = vmatprep.subr.bf16.mxu0 %v4279_v60 }
 0x69b   : > { %4061 = vmatpush3.bf16.msra.mxu1 %v4060_v56  ;;  %3570 = vmatprep.mubr.msk.f32.mxu1 %vm4280_vm15, %v4277_v7 }
 0x69c   : > { %4062 = vmatprep.subr.bf16.mxu1 %v4279_v60 }
 0x69f   : > { %4064 = vmatpush3.bf16.msra.mxu1 %v4063_v58 }
 0x6a0   : > { %4065 = vmatprep.subr.bf16.mxu1 %v4279_v60 }
 0x6a3   : > { %4067 = vmatpush3.bf16.msra.mxu1 %v4066_v63 }
 0x6a4   : > { %4068 = vmatprep.subr.bf16.mxu1 %v4279_v60 }
 0x6a7   : > { %4070 = vmatpush3.bf16.msra.mxu1 %v4069_v2 }
 0x6a8   : > { %4071 = vmatprep.subr.bf16.mxu1 %v4279_v60 }
 0x6ab   : > { %4073 = vmatpush3.bf16.msra.mxu1 %v4072_v5  ;;  %v2970_v5 = vld [vmem:[%s6018_s15 + $0x70] sm:$0xff] }
 0x6ac   : > { %4098 = vmatprep.subr.bf16.mxu1 %v4279_v60 }
 0x6ae   : > { %3571 = vmatmul.mubr.msk.f32.vlgmr.msra.gmra.mrb[24].mxu1 %vm2468_vm0, %v2791_v6  ;;  %v2971_v6 = vld [vmem:[%s6018_s15 + $0x78] sm:$0xff] }
 0x6af   : > { %3640 = vmatprep.mubr.msk.f32.mxu1 %vm4280_vm15, %v4277_v7  ;;  %v2871_v7 = vld [vmem:[%s6016_s13 + $0x18] sm:$0xff]  ;;  %4100 = vmatpush3.bf16.msra.mxu1 %v4099_v39  ;;  %v4120_v8 = vpack.c.bf16 %v2971_v6, %v2970_v5 }
 0x6b0   : > { %v4078_v13 = vpack.c.bf16 %v2871_v7, %v2870_v12  ;;  %4101 = vmatprep.subr.bf16.mxu1 %v4279_v60 }
 0x6b2   : > { %4079 = vmatpush3.bf16.msra.mxu0 %v4078_v13 }
 0x6b3   : > { %4080 = vmatprep.subr.bf16.mxu0 %v4279_v60  ;;  %4103 = vmatpush3.bf16.msra.mxu1 %v4102_v22 }
 0x6b4   : > { %4104 = vmatprep.subr.bf16.mxu1 %v4279_v60 }
 0x6b6   : > { %4082 = vmatpush3.bf16.msra.mxu0 %v4081_v16 }
 0x6b7   : > { %4083 = vmatprep.subr.bf16.mxu0 %v4279_v60  ;;  %4106 = vmatpush3.bf16.msra.mxu1 %v4105_v40 }
 0x6b8   : > { %4107 = vmatprep.subr.bf16.mxu1 %v4279_v60 }
 0x6ba   : > { %4085 = vmatpush3.bf16.msra.mxu0 %v4084_v18 }
 0x6bb   : > { %4086 = vmatprep.subr.bf16.mxu0 %v4279_v60  ;;  %4109 = vmatpush3.bf16.msra.mxu1 %v4108_v43 }
 0x6bc   : > { %4110 = vmatprep.subr.bf16.mxu1 %v4279_v60 }
 0x6be   : > { %4088 = vmatpush3.bf16.msra.mxu0 %v4087_v24 }
 0x6bf   : > { %4089 = vmatprep.subr.bf16.mxu0 %v4279_v60  ;;  %4112 = vmatpush3.bf16.msra.mxu1 %v4111_v38 }
 0x6c0   : > { %4113 = vmatprep.subr.bf16.mxu1 %v4279_v60 }
 0x6c2   : > { %4091 = vmatpush3.bf16.msra.mxu0 %v4090_v28 }
 0x6c3   : > { %4092 = vmatprep.subr.bf16.mxu0 %v4279_v60  ;;  %4115 = vmatpush3.bf16.msra.mxu1 %v4114_v47 }
 0x6c4   : > { %4116 = vmatprep.subr.bf16.mxu1 %v4279_v60 }
 0x6c6   : > { %4094 = vmatpush3.bf16.msra.mxu0 %v4093_v31 }
 0x6c7   : > { %4095 = vmatprep.subr.bf16.mxu0 %v4279_v60  ;;  %4118 = vmatpush3.bf16.msra.mxu1 %v4117_v52 }
 0x6c8   : > { %4119 = vmatprep.subr.bf16.mxu1 %v4279_v60 }
 0x6ca   : > { %4097 = vmatpush3.bf16.msra.mxu0 %v4096_v33 }
 0x6cb   : > { %4121 = vmatpush3.bf16.msra.mxu1 %v4120_v8 }
 0x757   : > { %v2609_v51 = vpop.f32.mrb[16].mxu0 }
 0x758   : > { %v3503_v55 = vpop.f32.mrb[17].mxu0 }
 0x759   : > { %v2537_v61 = vpop.f32.mrb[20].mxu1 }
 0x75a   : > { %v2610_v56 = vadd.f32 %v2609_v51, %v2537_v61  ;;  %v3480_v44 = vpop.f32.mrb[21].mxu1 }
 0x76b   : > { %v2776_v54 = vpop.f32.mrb[18].mxu0 }
 0x76c   : > { %v3549_v57 = vpop.f32.mrb[19].mxu0 }
 0x76d   : > { %v2692_v58 = vpop.f32.mrb[22].mxu1 }
 0x76e   : > { %v2696_v59 = vadd.f32 %v2692_v58, %v2610_v56  ;;  %v3526_v62 = vpop.f32.mrb[23].mxu1 }
 0x770   : > { %v2780_v63 = vadd.f32 %v2776_v54, %v2696_v59 }
 0x781   : > { %v2860_v0 = vpop.f32.mrb[24].mxu1 }
 0x782   : > { %v2864_v2 = vadd.f32 %v2860_v0, %v2780_v63  ;;  %v3572_v3 = vpop.f32.mrb[25].mxu1 }
 0x784   : > { %v2866_v60 = vadd.f32 %v2865_v1, %v2864_v2 }
 0x786   : > { %v2867_v4 = vmax.f32 %v2866_v60, 0.0 }
 0x788   : > { %3606 = vmatmul.mubr.f32.vlgmr.msra.gmra.mrb[20].mxu0 %v2867_v4 }
 0x85b   : > { %v2951_v11 = vpop.f32.mrb[20].mxu0 }
 0x85c   : > { %v2952_v12 = vadd.f32 %v2951_v11, %v2884_v9  ;;  %v3607_v7 = vpop.f32.mrb[21].mxu0 }
 0x85e   : > { %v2955_v13 = vmax.f32 %v2952_v12, 0.0 }
 0x860   : > { %3641 = vmatmul.mubr.f32.vlgmr.msra.gmra.mrb[26].mxu1 %v2955_v13 }
 0x933   : > { %v3039_v14 = vpop.f32.mrb[26].mxu1 }
 0x934   : > { %v3040_v15 = vadd.f32 %v3039_v14, %v2972_v21  ;;  %v3642_v16 = vpop.f32.mrb[27].mxu1 }
 0x936   : > { %3043 = vst [vmem:[%s540_s0] sm:$0x1] %v3040_v15 }
 0x937   : > { %4226 = shalt.err (!%p4223_p3)
}
 0x938   : > { %s4227_s29 = scalar_lea.hbm %s5961_s21, 16  ;;  %s4231_s0 = scalar_lea.hbm %s6044_s17, 32 }
 0x939   : > { %p4228_p4 = scmp.ne.s32.totalorder %s5961_s21, %s4227_s29  ;;  %p4232_p9 = scmp.lt.u32.totalorder %s5961_s21, %s6044_s17 }
 0x93a   : > { %p4233_p10 = scmp.lt.u32.totalorder %s4231_s0, %s4227_s29  ;;  %p4235_p12 = scmp.lt.u32.totalorder %s4227_s29, %s5961_s21 }
 0x93b   : > { %p4229_p7 = pnand %p4228_p4, %p4410_p5 }
 0x93c   : > { %p4234_p11 = por %p4233_p10, %p4232_p9 }
 0x93d   : > { %p4230_p8 = pneg %p4229_p7 }
 0x93e   : > { %p4236_p13 = por %p4235_p12, %p4234_p11 }
 0x940   : > { %p4237_p0 = pnand %p4236_p13, %p4230_p8 }
 0x942   : > { %4240 = shalt.err (!%p4237_p0)
}
 0x943   : > { %4170 = dma.vmem_to_hbm [thread:$0]  (%p4410_p5), %s5963_s24, 16, %s5961_s21, %s3045_s30  }
 0x944 PF: > { %s6045_s19 = sld [smem:[#allocation7_spill]]  ;;  %s6046_s28 = sld [smem:[#allocation5_spill]] }
 0x94a   : > { %p4176_p1 = scmp.ge.s32.totalorder %s6045_s19, 2  ;;  %s3069_s22 = sand.u32 1, %s6046_s28  }
 0x94b   : > { %s3070_s16 = scalar_lea.sflag [#allocation3], %s3069_s22 }
 0x94c   : > { %p4173_p2 = pnand %p4176_p1, %p4414_p6 }
 0x94e   : > { %4258 = dma.done.wait (!%p4173_p2), %s3070_s16, 16  }
 0x94f   : > { %4260 = vsyncadd (!%p4173_p2), %s3070_s16, 4294967280  ;;  %s6048_s27 = sld [smem:[#allocation8_spill]]  ;;  %s6049_s29 = sld [smem:[#allocation6_spill]] }
 0x950   : > { %s6050_s26 = sld [smem:[#allocation9_spill]]  ;;  %s6051_s24 = smov %s4267_s25 }
 0x955   : > { %p27_p3 = scmp.ge.s32.totalorder %s6048_s27, 4   ;;  %s6052_s25 = smov %s6049_s29 }
 0x957   :  { %29 = sbr.rel (!%p27_p3) target bundleno = 8 (0x8), region = 131 }
 0x95e   :  { %3074 = vsyncpa [#allocation3], 1 }
 0x95f   :  { %3076 = vsyncpa [#allocation3 + $0x1], 1 }

</bundles_post_ra>
